<compile_context>
chip_gen: v7x
topology: tpu7x:2x2x1
jax: 0.10.0
libtpu: 0.0.40
codegen_flags: <defaults>
</compile_context>

<pallas_src>
import jax
import jax.numpy as jnp
import numpy as np
from jax.experimental import pallas as pl
from jax.experimental.pallas import tpu as pltpu


def _round_up(x, m):
    return (x + m - 1) // m * m


def _cdiv(a, b):
    return -(-a // b)


# ---------------------------------------------------------------------------
# One-time capability probe: can this Pallas build single-buffer a
# grid-invariant operand via pipeline_mode=pl.Buffered(1)?
# ---------------------------------------------------------------------------
def _copy_probe_kernel(x_ref, o_ref):
    o_ref[...] = x_ref[...]


def _probe_single_buffer_weights():
    if not hasattr(pl, "Buffered"):
        return False
    try:
        fn = pl.pallas_call(
            _copy_probe_kernel,
            out_shape=jax.ShapeDtypeStruct((16, 128), jnp.float32),
            grid=(2,),
            in_specs=[pl.BlockSpec((8, 128), lambda i: (0, 0),
                                   pipeline_mode=pl.Buffered(1))],
            out_specs=pl.BlockSpec((8, 128), lambda i: (i, 0)),
        )
        jax.block_until_ready(fn(jnp.zeros((8, 128), jnp.float32)))
        return True
    except Exception:
        return False


_SINGLE_BUFFER_WEIGHTS = _probe_single_buffer_weights()


# ---------------------------------------------------------------------------
# Kernel
# ---------------------------------------------------------------------------
def _film_decoder_kernel(adv_ref, x_ref, fv_ref, fc_ref,
                         w1_ref, w2_ref, w3_ref, b3_ref, o_ref):
    """One token tile of the FiLM-modulated 3-layer MLP.

    adv_ref : (tm, 1)   f32  scalar advantage per token
    x_ref   : (tm, Ep)  any  even-token encoder features (cast in-kernel)
    fv_ref  : (4, Ep)   f32  folded FiLM slope  rows = [g0, be0', g1, be1']
    fc_ref  : (4, Ep)   f32  folded FiLM offset rows = [g0, be0', g1, be1']
                             (b1 / b2 already folded into the beta rows)
    w*_ref  : (Ep, Ep)  cdt  linear weights pre-transposed to (in, out)
    b3_ref  : (1, Ep)   f32  last-layer bias
    """
    adv = adv_ref[...]                                       # (tm, 1) f32
    cdt = w1_ref.dtype

    # FiLM params are affine in the scalar advantage (folded adv_embed + film).
    g0 = adv * fv_ref[0:1, :] + fc_ref[0:1, :]               # (tm, Ep) f32
    be0 = adv * fv_ref[1:2, :] + fc_ref[1:2, :]              # b1 folded in

    h = jnp.dot(x_ref[...].astype(cdt), w1_ref[...],
                preferred_element_type=jnp.float32)
    h = jnp.maximum(g0 * h + be0, 0.0)

    # Lazily build the layer-2 FiLM params to keep fewer (tm, Ep) f32 live.
    g1 = adv * fv_ref[2:3, :] + fc_ref[2:3, :]
    be1 = adv * fv_ref[3:4, :] + fc_ref[3:4, :]              # b2 folded in

    h = jnp.dot(h.astype(cdt), w2_ref[...],
                preferred_element_type=jnp.float32)
    h = jnp.maximum(g1 * h + be1, 0.0)

    h = jnp.dot(h.astype(cdt), w3_ref[...],
                preferred_element_type=jnp.float32) + b3_ref[...]
    o_ref[...] = h.astype(o_ref.dtype)


# ---------------------------------------------------------------------------
# Tile-size selection
# ---------------------------------------------------------------------------
def _choose_tm(n, sublane, tm_max, min_steps=4):
    """Largest sublane-multiple tile <= tm_max that still yields >= min_steps
    grid steps (keeps both v7x TensorCores busy with a pipelined loop)."""
    tm_max = max(sublane, tm_max // sublane * sublane)
    n_round = _round_up(max(n, 1), sublane)
    tm = min(tm_max, n_round)
    while tm > sublane and _cdiv(n_round, tm) < min_steps:
        tm = max(sublane, (tm // 2) // sublane * sublane)
    return tm


# ---------------------------------------------------------------------------
# Wrapper
# ---------------------------------------------------------------------------
def rl_film_decoder(agent_advs, enc_src, kparams, *, tm_max=None,
                    min_grid_steps=4):
    """agent_advs: (B, L, 1), enc_src: (B, 2L, E). Returns (B, L, E)."""
    B, L, _ = agent_advs.shape
    E = int(kparams["embed_dim"])
    Ep = kparams["w1_t"].shape[0]                 # lane-padded embed dim
    N = B * L
    compute_dtype = kparams["w1_t"].dtype

    adv = agent_advs.reshape(N, 1).astype(jnp.float32)

    if Ep == E:
        # Lane-aligned E (multiple of 128): view (B, 2L, E) as (N, 2E) -- a free
        # contiguous reshape.  The even tokens are exactly columns [0:E] of each
        # row, so the BlockSpec DMAs them straight from HBM.  The stored dtype
        # is kept; any bf16 cast happens in-kernel on the (tm, E) tile only.
        x = enc_src.reshape(N, 2 * E)
    else:
        # Small / unaligned E fallback: materialize the even-token slice and
        # zero-pad the lane dim to 128 so matmuls and output stores run
        # lane-dense (no masked vst.msk at 25% lane utilization).
        x = enc_src[:, 0::2].reshape(N, E)
        x = jnp.pad(x, ((0, 0), (0, Ep - E)))

    # Second-to-last block dims must be a multiple of the dtype sublane.
    sublane = 16 if min(x.dtype.itemsize, compute_dtype.itemsize) < 4 else 8

    try:
        vmem_cap_bytes = int(pltpu.get_tpu_info().vmem_capacity_bytes)
    except Exception:
        vmem_cap_bytes = 64 * 2 ** 20             # conservative (v7x per-TC)
    if tm_max is None:
        # 128 MiB parts (v5e/v6e) afford bigger token tiles than v7x (64 MiB).
        tm_max = 512 if vmem_cap_bytes >= 96 * 2 ** 20 else 256

    tm = _choose_tm(N, sublane, tm_max, min_grid_steps)
    # Ragged final block handled by Pallas boundary masking -> no wrapper pad.
    grid = (_cdiv(N, tm),)

    # VMEM budget: weights (single or double buffered), double-buffered token
    # I/O, plus in-kernel f32 temporaries; capped at 75% of physical VMEM so
    # the compiler keeps headroom for spill/internal scratch.
    isw = compute_dtype.itemsize
    isx = x.dtype.itemsize
    n_wbuf = 1 if _SINGLE_BUFFER_WEIGHTS else 2
    w_bytes = n_wbuf * (3 * Ep * Ep * isw + Ep * 4 + 2 * 4 * Ep * 4)
    act_bytes = 2 * (tm * 4 + tm * Ep * isx + tm * Ep * isw)
    tmp_bytes = 6 * tm * Ep * 4
    need = w_bytes + act_bytes + tmp_bytes
    vmem_limit = int(min(vmem_cap_bytes * 3 // 4,
                         max(2 * need, 32 * 2 ** 20)))

    cost = pl.CostEstimate(
        flops=6 * N * Ep * Ep,
        transcendentals=0,
        bytes_accessed=(N * (4 + Ep * isx + Ep * isw)
                        + 3 * Ep * Ep * isw + 9 * Ep * 4))

    def winv(shape):
        # Grid-invariant operand: one resident VMEM buffer is enough.
        if _SINGLE_BUFFER_WEIGHTS:
            return pl.BlockSpec(shape, lambda i: (0, 0),
                                pipeline_mode=pl.Buffered(1))
        return pl.BlockSpec(shape, lambda i: (0, 0))

    out = pl.pallas_call(
        _film_decoder_kernel,
        out_shape=jax.ShapeDtypeStruct((N, Ep), compute_dtype),
        grid_spec=pltpu.PrefetchScalarGridSpec(
            num_scalar_prefetch=0,
            grid=grid,
            in_specs=[
                pl.BlockSpec((tm, 1), lambda i: (i, 0)),    # advantage scalar
                pl.BlockSpec((tm, Ep), lambda i: (i, 0)),   # even-token feats
                winv((4, Ep)),                              # FiLM slopes
                winv((4, Ep)),                              # FiLM offsets
                winv((Ep, Ep)),                             # linear1 (in,out)
                winv((Ep, Ep)),                             # linear2
                winv((Ep, Ep)),                             # linear3
                winv((1, Ep)),                              # b3
            ],
            out_specs=pl.BlockSpec((tm, Ep), lambda i: (i, 0)),
        ),
        compiler_params=pltpu.CompilerParams(
            dimension_semantics=("parallel",),
            vmem_limit_bytes=vmem_limit),
        cost_estimate=cost,
    )(adv, x, kparams["film_v"], kparams["film_c"],
      kparams["w1_t"], kparams["w2_t"], kparams["w3_t"], kparams["b3"])

    if Ep != E:
        out = out[:, :E]
    return out.reshape(B, L, E)


# ---------------------------------------------------------------------------
# Parameters
# ---------------------------------------------------------------------------
def init_raw_params(key, embed_dim):
    """PyTorch-layout weights: Linear(in, out) stored as W (out, in), b (out,)."""
    E = embed_dim
    ks = jax.random.split(key, 10)
    scale = 0.1

    def lin(kw, kb, fan_in, fan_out):
        w = scale * jax.random.normal(kw, (fan_out, fan_in), jnp.float32)
        b = scale * jax.random.normal(kb, (fan_out,), jnp.float32)
        return w, b

    w_adv, b_adv = lin(ks[0], ks[1], 1, E)
    w_film, b_film = lin(ks[2], ks[3], E, 4 * E)
    w1, b1 = lin(ks[4], ks[5], E, E)
    w2, b2 = lin(ks[6], ks[7], E, E)
    w3, b3 = lin(ks[8], ks[9], E, E)
    return dict(w_adv=w_adv, b_adv=b_adv, w_film=w_film, b_film=b_film,
                w1=w1, b1=b1, w2=w2, b2=b2, w3=w3, b3=b3)


def prepare_kernel_params(raw, compute_dtype=jnp.float32):
    """Fold adv_embed + film into one affine map of the scalar advantage,
    fold the linear1/linear2 biases into the FiLM beta rows, pre-transpose the
    linear weights to (in, out), and lane-pad everything to a multiple of 128.
    All folds are exact up to f32 re-association."""
    E = raw["w1"].shape[0]
    Ep = _round_up(E, 128)
    f32 = jnp.float32

    # film = adv * film_v + film_c, rows = [gamma0, beta0, gamma1, beta1].
    w_adv_row = raw["w_adv"].astype(f32).T                          # (1, E)
    w_film_t = raw["w_film"].astype(f32).T                          # (E, 4E)
    film_v = (w_adv_row @ w_film_t).reshape(4, E)
    film_c = (raw["b_adv"].astype(f32)[None, :] @ w_film_t
              + raw["b_film"].astype(f32)[None, :]).reshape(4, E)

    # g*(xW + b) + be = g*(xW) + (g*b + be); g, be affine in adv, so fold b1/b2
    # into the beta rows' slope and offset.
    b1 = raw["b1"].astype(f32)[None, :]
    b2 = raw["b2"].astype(f32)[None, :]
    film_v = film_v.at[1:2, :].add(film_v[0:1, :] * b1)
    film_v = film_v.at[3:4, :].add(film_v[2:3, :] * b2)
    film_c = film_c.at[1:2, :].add(film_c[0:1, :] * b1)
    film_c = film_c.at[3:4, :].add(film_c[2:3, :] * b2)

    def pad_lane(a):
        if Ep == E:
            return a
        return jnp.pad(a, [(0, 0)] * (a.ndim - 1) + [(0, Ep - E)])

    def pad_mat(w):
        if Ep == E:
            return w
        return jnp.pad(w, ((0, Ep - E), (0, Ep - E)))

    return {
        "embed_dim": E,
        "film_v": pad_lane(film_v),
        "film_c": pad_lane(film_c),
        "w1_t": pad_mat(raw["w1"].astype(f32).T).astype(compute_dtype),
        "w2_t": pad_mat(raw["w2"].astype(f32).T).astype(compute_dtype),
        "w3_t": pad_mat(raw["w3"].astype(f32).T).astype(compute_dtype),
        "b3": pad_lane(raw["b3"].astype(f32).reshape(1, E)),
    }


def reference(agent_advs, enc_src, raw):
    """Pure-JAX f32 reference matching the PyTorch forward exactly."""
    B, L, _ = agent_advs.shape
    E = raw["w1"].shape[0]
    adv_emb = agent_advs @ raw["w_adv"].T + raw["b_adv"]
    out = enc_src[:, 0::2].astype(jnp.float32)
    film = (adv_emb @ raw["w_film"].T + raw["b_film"]).reshape(B, L, 2, 2 * E)
    gamma, beta = film[..., :E], film[..., E:]
    out = jax.nn.relu(gamma[:, :, 0] * (out @ raw["w1"].T + raw["b1"]) + beta[:, :, 0])
    out = jax.nn.relu(gamma[:, :, 1] * (out @ raw["w2"].T + raw["b2"]) + beta[:, :, 1])
    return out @ raw["w3"].T + raw["b3"]


# ---------------------------------------------------------------------------
if __name__ == "__main__":
    key = jax.random.PRNGKey(0)
    k_adv, k_enc, k_par, k_adv2, k_enc2, k_par2 = jax.random.split(key, 6)

    # -------- primary case: lane-aligned E (multiple of 128) ----------------
    B, L, E = 4, 128, 128
    agent_advs = jax.random.normal(k_adv, (B, L, 1), jnp.float32)
    enc_src = jax.random.normal(k_enc, (B, 2 * L, E), jnp.float32)
    raw = init_raw_params(k_par, E)
    ref = reference(agent_advs, enc_src, raw)

    # f32 path: same numerics as the PyTorch module up to f32 re-association
    # of the folded FiLM / bias terms.
    out32 = rl_film_decoder(agent_advs, enc_src,
                            prepare_kernel_params(raw, jnp.float32))
    out32 = jax.block_until_ready(out32)
    assert out32.shape == (B, L, E)
    np.testing.assert_allclose(np.asarray(out32), np.asarray(ref),
                               rtol=1e-4, atol=1e-4)

    # bf16 weight path: enc_src stays f32 in HBM; the (tm, E) tile is cast to
    # bf16 in-kernel (bf16 MXU inputs, f32 accumulation / FiLM math).
    out16 = rl_film_decoder(agent_advs, enc_src,
                            prepare_kernel_params(raw, jnp.bfloat16))
    out16 = jax.block_until_ready(out16)
    assert out16.shape == (B, L, E) and out16.dtype == jnp.bfloat16
    np.testing.assert_allclose(np.asarray(out16.astype(jnp.float32)),
                               np.asarray(ref), rtol=1e-1, atol=1e-1)

    # -------- fallback: small unaligned E (lane-padded) + ragged tokens -----
    B2, L2, E2 = 3, 10, 32
    agent_advs2 = jax.random.normal(k_adv2, (B2, L2, 1), jnp.float32)
    enc_src2 = jax.random.normal(k_enc2, (B2, 2 * L2, E2), jnp.float32)
    raw2 = init_raw_params(k_par2, E2)
    out2 = rl_film_decoder(agent_advs2, enc_src2,
                           prepare_kernel_params(raw2, jnp.float32))
    out2 = jax.block_until_ready(out2)
    np.testing.assert_allclose(np.asarray(out2),
                               np.asarray(reference(agent_advs2, enc_src2, raw2)),
                               rtol=1e-4, atol=1e-4)

    print("KERNEL_OK")
</pallas_src>

<mosaic_0001>
module attributes {stable_mosaic.version = 11 : i64} {
  func.func @_copy_probe_kernel(%arg0: i32, %arg1: memref<8x128xf32, #tpu.memory_space<vmem>>, %arg2: memref<8x128xf32, #tpu.memory_space<vmem>>) attributes {dimension_semantics = [#tpu.dimension_semantics<arbitrary>], iteration_bounds = array<i64: 2>, scalar_prefetch = 0 : i64, scratch_operands = 0 : i64, tpu.core_type = #tpu.core_type<tc>, window_params = [{pipeline_mode = #tpu.pipeline_mode<synchronous>, transform_indices = @transform_0, window_bounds = array<i64: 8, 128>}, {transform_indices = @transform_1, window_bounds = array<i64: 8, 128>}]} {
    %c0 = arith.constant 0 : index
    %c0_0 = arith.constant 0 : index
    %0 = vector.load %arg1[%c0, %c0_0] : memref<8x128xf32, #tpu.memory_space<vmem>>, vector<8x128xf32>
    %c0_1 = arith.constant 0 : index
    %c0_2 = arith.constant 0 : index
    %1 = vector.load %arg2[%c0_1, %c0_2] : memref<8x128xf32, #tpu.memory_space<vmem>>, vector<8x128xf32>
    tpu.vector_store %arg2[%c0_1, %c0_2], %0 {strides = array<i32>} : memref<8x128xf32, #tpu.memory_space<vmem>>, vector<8x128xf32>,
    return
  }
  func.func @transform_0(%arg0: i32) -> (i32, i32) {
    %c0_i32 = arith.constant 0 : i32
    %c0_i32_0 = arith.constant 0 : i32
    %c0_i32_1 = arith.constant 0 : i32
    return %c0_i32, %c0_i32_0 : i32, i32
  }
  func.func @transform_1(%arg0: i32) -> (i32, i32) {
    %c0_i32 = arith.constant 0 : i32
    %c0_i32_0 = arith.constant 0 : i32
    return %arg0, %c0_i32 : i32, i32
  }
}

module attributes {stable_mosaic.version = 11 : i64} {
  func.func @_film_decoder_kernel(%arg0: i32, %arg1: memref<128x1xf32, #tpu.memory_space<vmem>>, %arg2: memref<128x128xf32, #tpu.memory_space<vmem>>, %arg3: memref<4x128xf32, #tpu.memory_space<vmem>>, %arg4: memref<4x128xf32, #tpu.memory_space<vmem>>, %arg5: memref<128x128xf32, #tpu.memory_space<vmem>>, %arg6: memref<128x128xf32, #tpu.memory_space<vmem>>, %arg7: memref<128x128xf32, #tpu.memory_space<vmem>>, %arg8: memref<1x128xf32, #tpu.memory_space<vmem>>, %arg9: memref<128x128xf32, #tpu.memory_space<vmem>>) attributes {dimension_semantics = [#tpu.dimension_semantics<parallel>], iteration_bounds = array<i64: 4>, scalar_prefetch = 0 : i64, scratch_operands = 0 : i64, tpu.core_type = #tpu.core_type<tc>, window_params = [{transform_indices = @transform_0, window_bounds = array<i64: 128, 1>}, {transform_indices = @transform_1, window_bounds = array<i64: 128, 128>}, {pipeline_mode = #tpu.pipeline_mode<synchronous>, transform_indices = @transform_2, window_bounds = array<i64: 4, 128>}, {pipeline_mode = #tpu.pipeline_mode<synchronous>, transform_indices = @transform_3, window_bounds = array<i64: 4, 128>}, {pipeline_mode = #tpu.pipeline_mode<synchronous>, transform_indices = @transform_4, window_bounds = array<i64: 128, 128>}, {pipeline_mode = #tpu.pipeline_mode<synchronous>, transform_indices = @transform_5, window_bounds = array<i64: 128, 128>}, {pipeline_mode = #tpu.pipeline_mode<synchronous>, transform_indices = @transform_6, window_bounds = array<i64: 128, 128>}, {pipeline_mode = #tpu.pipeline_mode<synchronous>, transform_indices = @transform_7, window_bounds = array<i64: 1, 128>}, {transform_indices = @transform_8, window_bounds = array<i64: 128, 128>}]} {
    %c0 = arith.constant 0 : index
    %c0_0 = arith.constant 0 : index
    %0 = vector.load %arg1[%c0, %c0_0] : memref<128x1xf32, #tpu.memory_space<vmem>>, vector<128x1xf32>
    %c0_1 = arith.constant 0 : index
    %c0_2 = arith.constant 0 : index
    %1 = vector.load %arg3[%c0_1, %c0_2] : memref<4x128xf32, #tpu.memory_space<vmem>>, vector<1x128xf32>
    %2 = vector.broadcast %0 : vector<128x1xf32> to vector<128x128xf32>
    %3 = vector.broadcast %1 : vector<1x128xf32> to vector<128x128xf32>
    %4 = arith.mulf %2, %3 : vector<128x128xf32>
    %c0_3 = arith.constant 0 : index
    %c0_4 = arith.constant 0 : index
    %5 = vector.load %arg4[%c0_3, %c0_4] : memref<4x128xf32, #tpu.memory_space<vmem>>, vector<1x128xf32>
    %6 = vector.broadcast %5 : vector<1x128xf32> to vector<128x128xf32>
    %7 = arith.addf %4, %6 : vector<128x128xf32>
    %c1 = arith.constant 1 : index
    %c0_5 = arith.constant 0 : index
    %8 = vector.load %arg3[%c1, %c0_5] : memref<4x128xf32, #tpu.memory_space<vmem>>, vector<1x128xf32>
    %9 = vector.broadcast %0 : vector<128x1xf32> to vector<128x128xf32>
    %10 = vector.broadcast %8 : vector<1x128xf32> to vector<128x128xf32>
    %11 = arith.mulf %9, %10 : vector<128x128xf32>
    %c1_6 = arith.constant 1 : index
    %c0_7 = arith.constant 0 : index
    %12 = vector.load %arg4[%c1_6, %c0_7] : memref<4x128xf32, #tpu.memory_space<vmem>>, vector<1x128xf32>
    %13 = vector.broadcast %12 : vector<1x128xf32> to vector<128x128xf32>
    %14 = arith.addf %11, %13 : vector<128x128xf32>
    %c0_8 = arith.constant 0 : index
    %c0_9 = arith.constant 0 : index
    %15 = vector.load %arg2[%c0_8, %c0_9] : memref<128x128xf32, #tpu.memory_space<vmem>>, vector<128x128xf32>
    %c0_10 = arith.constant 0 : index
    %c0_11 = arith.constant 0 : index
    %16 = vector.load %arg5[%c0_10, %c0_11] : memref<128x128xf32, #tpu.memory_space<vmem>>, vector<128x128xf32>
    %cst = arith.constant dense<0.000000e+00> : vector<128x128xf32>
    %17 = tpu.matmul %15, %16, %cst {dimension_numbers = #tpu.dot_dimension_numbers<[1], [0], [0], [1], [0, 0, 1, 1], [], []>} : vector<128x128xf32>, vector<128x128xf32>, vector<128x128xf32> -> vector<128x128xf32>
    %18 = arith.mulf %7, %17 : vector<128x128xf32>
    %19 = arith.addf %18, %14 : vector<128x128xf32>
    %cst_12 = arith.constant 0.000000e+00 : f32
    %20 = vector.broadcast %cst_12 : f32 to vector<128x128xf32>
    %21 = arith.maximumf %19, %20 : vector<128x128xf32>
    %c2 = arith.constant 2 : index
    %c0_13 = arith.constant 0 : index
    %22 = vector.load %arg3[%c2, %c0_13] : memref<4x128xf32, #tpu.memory_space<vmem>>, vector<1x128xf32>
    %23 = vector.broadcast %0 : vector<128x1xf32> to vector<128x128xf32>
    %24 = vector.broadcast %22 : vector<1x128xf32> to vector<128x128xf32>
    %25 = arith.mulf %23, %24 : vector<128x128xf32>
    %c2_14 = arith.constant 2 : index
    %c0_15 = arith.constant 0 : index
    %26 = vector.load %arg4[%c2_14, %c0_15] : memref<4x128xf32, #tpu.memory_space<vmem>>, vector<1x128xf32>
    %27 = vector.broadcast %26 : vector<1x128xf32> to vector<128x128xf32>
    %28 = arith.addf %25, %27 : vector<128x128xf32>
    %c3 = arith.constant 3 : index
    %c0_16 = arith.constant 0 : index
    %29 = vector.load %arg3[%c3, %c0_16] : memref<4x128xf32, #tpu.memory_space<vmem>>, vector<1x128xf32>
    %30 = vector.broadcast %0 : vector<128x1xf32> to vector<128x128xf32>
    %31 = vector.broadcast %29 : vector<1x128xf32> to vector<128x128xf32>
    %32 = arith.mulf %30, %31 : vector<128x128xf32>
    %c3_17 = arith.constant 3 : index
    %c0_18 = arith.constant 0 : index
    %33 = vector.load %arg4[%c3_17, %c0_18] : memref<4x128xf32, #tpu.memory_space<vmem>>, vector<1x128xf32>
    %34 = vector.broadcast %33 : vector<1x128xf32> to vector<128x128xf32>
    %35 = arith.addf %32, %34 : vector<128x128xf32>
    %c0_19 = arith.constant 0 : index
    %c0_20 = arith.constant 0 : index
    %36 = vector.load %arg6[%c0_19, %c0_20] : memref<128x128xf32, #tpu.memory_space<vmem>>, vector<128x128xf32>
    %cst_21 = arith.constant dense<0.000000e+00> : vector<128x128xf32>
    %37 = tpu.matmul %21, %36, %cst_21 {dimension_numbers = #tpu.dot_dimension_numbers<[1], [0], [0], [1], [0, 0, 1, 1], [], []>} : vector<128x128xf32>, vector<128x128xf32>, vector<128x128xf32> -> vector<128x128xf32>
    %38 = arith.mulf %28, %37 : vector<128x128xf32>
    %39 = arith.addf %38, %35 : vector<128x128xf32>
    %cst_22 = arith.constant 0.000000e+00 : f32
    %40 = vector.broadcast %cst_22 : f32 to vector<128x128xf32>
    %41 = arith.maximumf %39, %40 : vector<128x128xf32>
    %c0_23 = arith.constant 0 : index
    %c0_24 = arith.constant 0 : index
    %42 = vector.load %arg7[%c0_23, %c0_24] : memref<128x128xf32, #tpu.memory_space<vmem>>, vector<128x128xf32>
    %cst_25 = arith.constant dense<0.000000e+00> : vector<128x128xf32>
    %43 = tpu.matmul %41, %42, %cst_25 {dimension_numbers = #tpu.dot_dimension_numbers<[1], [0], [0], [1], [0, 0, 1, 1], [], []>} : vector<128x128xf32>, vector<128x128xf32>, vector<128x128xf32> -> vector<128x128xf32>
    %c0_26 = arith.constant 0 : index
    %c0_27 = arith.constant 0 : index
    %44 = vector.load %arg8[%c0_26, %c0_27] : memref<1x128xf32, #tpu.memory_space<vmem>>, vector<1x128xf32>
    %45 = vector.broadcast %44 : vector<1x128xf32> to vector<128x128xf32>
    %46 = arith.addf %43, %45 : vector<128x128xf32>
    %c0_28 = arith.constant 0 : index
    %c0_29 = arith.constant 0 : index
    %47 = vector.load %arg9[%c0_28, %c0_29] : memref<128x128xf32, #tpu.memory_space<vmem>>, vector<128x128xf32>
    tpu.vector_store %arg9[%c0_28, %c0_29], %46 {strides = array<i32>} : memref<128x128xf32, #tpu.memory_space<vmem>>, vector<128x128xf32>,
    return
  }
  func.func @transform_0(%arg0: i32) -> (i32, i32) {
    %c0_i32 = arith.constant 0 : i32
    %c0_i32_0 = arith.constant 0 : i32
    return %arg0, %c0_i32 : i32, i32
  }
  func.func @transform_1(%arg0: i32) -> (i32, i32) {
    %c0_i32 = arith.constant 0 : i32
    %c0_i32_0 = arith.constant 0 : i32
    return %arg0, %c0_i32 : i32, i32
  }
  func.func @transform_2(%arg0: i32) -> (i32, i32) {
    %c0_i32 = arith.constant 0 : i32
    %c0_i32_0 = arith.constant 0 : i32
    %c0_i32_1 = arith.constant 0 : i32
    return %c0_i32, %c0_i32_0 : i32, i32
  }
  func.func @transform_3(%arg0: i32) -> (i32, i32) {
    %c0_i32 = arith.constant 0 : i32
    %c0_i32_0 = arith.constant 0 : i32
    %c0_i32_1 = arith.constant 0 : i32
    return %c0_i32, %c0_i32_0 : i32, i32
  }
  func.func @transform_4(%arg0: i32) -> (i32, i32) {
    %c0_i32 = arith.constant 0 : i32
    %c0_i32_0 = arith.constant 0 : i32
    %c0_i32_1 = arith.constant 0 : i32
    return %c0_i32, %c0_i32_0 : i32, i32
  }
  func.func @transform_5(%arg0: i32) -> (i32, i32) {
    %c0_i32 = arith.constant 0 : i32
    %c0_i32_0 = arith.constant 0 : i32
    %c0_i32_1 = arith.constant 0 : i32
    return %c0_i32, %c0_i32_0 : i32, i32
  }
  func.func @transform_6(%arg0: i32) -> (i32, i32) {
    %c0_i32 = arith.constant 0 : i32
    %c0_i32_0 = arith.constant 0 : i32
    %c0_i32_1 = arith.constant 0 : i32
    return %c0_i32, %c0_i32_0 : i32, i32
  }
  func.func @transform_7(%arg0: i32) -> (i32, i32) {
    %c0_i32 = arith.constant 0 : i32
    %c0_i32_0 = arith.constant 0 : i32
    %c0_i32_1 = arith.constant 0 : i32
    return %c0_i32, %c0_i32_0 : i32, i32
  }
  func.func @transform_8(%arg0: i32) -> (i32, i32) {
    %c0_i32 = arith.constant 0 : i32
    %c0_i32_0 = arith.constant 0 : i32
    return %arg0, %c0_i32 : i32, i32
  }
}

</mosaic_0001>

<bundles_post_ra>
// kernel: tpu_custom_call.1
= control target key start
LH: loop header
LB: loop body
LE: loop exit
PB: predicated region body
PF: predicated region fallthrough
CT: control target
= control target key end

     0   :  { %6 = vsyncpa [#allocation3], 0  ;;  %s481_s0 = inlined_call_operand.hbm [shape: f32[8,128], index: 0, kind: input, shape index: {}]   ;;  %s482_s1 = inlined_call_operand.hbm [shape: f32[16,128], index: 1, kind: output, shape index: {}]  }
   0x1   :  { %7 = vsyncpa [#allocation4], 0 }
   0x2   :  { %9 = vsyncpa [#allocation4 + $0x1], 0  ;;  %s351_s6 = smov 0   ;;  %s353_s7 = smov 0  }
   0x3   :  { %s355_s8 = smov 0   ;;  %s357_s9 = smov 0  }
   0x4 LB: > { %s372_s10 = sadd.s32 4294967295, %s337_s9   ;;  %s183_s11 = sadd.s32 4294967294, %s337_s9   ;;  %s337_s9 = sphi %s357_s9, %s498_s9   ;;  %s333_s8 = sphi %s355_s8, %s497_s8   ;;  %s329_s7 = sphi %s353_s7, %s496_s7   ;;  %s325_s6 = sphi %s351_s6, %s495_s6  }
   0x5   : > { %s376_s12 = sadd.s32 1, %s337_s9   ;;  %s43_s13 = sadd.s32 1, %s333_s8 }
   0x6   : > { %s40_s14 = ssub.s32 %s337_s9, %s376_s12  ;;  %p53_p0 = scmp.ne.s32.totalorder %s333_s8, %s329_s7 }
   0x7   : > { %p41_p1 = scmp.eq.s32.totalorder %s40_s14, 0  ;;  %p54_p2 = scmp.eq.s32.totalorder %s372_s10, 1 }
   0x8   : > { %p59_p3 = scmp.ne.s32.totalorder %s329_s7, %s325_s6  ;;  %p60_p4 = scmp.eq.s32.totalorder %s183_s11, 1 }
   0x9   : > { %s387_s15 = scalar_select %p41_p1, %s333_s8, %s43_s13  }
   0xa   : > { %p389_p5 = por %p54_p2, %p53_p0  ;;  %p393_p6 = por %p60_p4, %p59_p3 }
   0xb   : > { %p184_p7 = scmp.ge.s32.totalorder %s337_s9, 1  ;;  %p67_p8 = scmp.lt.s32.totalorder %s337_s9, 3 }
   0xc   : > { %s486_s16 = scalar_select %p389_p5, 1, 0 }
   0xd   : > { %s487_s17 = scalar_select %p393_p6, 1, 0 }
   0xe   : > { %p483_p9 = scmp.eq.s32.totalorder %s372_s10, 0  ;;  %p400_p10 = pnand %p184_p7, %p67_p8 }
   0xf   : > { %s339_s19 = smov [#allocation2]   ;;  %s243_s24 = scalar_lea.hbm %s481_s0, 128 }
  0x10   : > { %s488_s18 = scalar_select %p400_p10, 1, 0 }
  0x11   : > { %s80_s20 = sshll.u32 %s339_s19, 4  ;;  %p199_p11 = pneg %p400_p10  ;;  %s81_s20 = int_to_ptr.vmem [resolvable:$true] %s80_s20 }
  0x12   : > { %p244_p13 = scmp.ne.s32.totalorder %s481_s0, %s243_s24  ;;  %p250_p3 = scmp.lt.u32.totalorder %s243_s24, %s481_s0 }
  0x13   : > { %p408_p12 = pnand %p483_p9, %p199_p11 }
  0x15   : > { %p245_p0 = pneg %p408_p12 }
  0x17   : > { %p246_p1 = pnand %p245_p0, %p244_p13 }
  0x19   : > { %p247_p2 = pneg %p246_p1 }
  0x1b   : > { %p252_p4 = pnand %p250_p3, %p247_p2 }
  0x1d   : > { %255 = shalt.err (!%p252_p4)
}
  0x1e   : > { %s256_s29 = scalar_lea.vmem %s81_s20, 128  ;;  %p264_p9 = scmp.lt.s32.totalorder %s81_s20, %s81_s20 }
  0x1f   : > { %p257_p7 = scmp.ne.s32.totalorder %s81_s20, %s256_s29  ;;  %p265_p6 = scmp.lt.s32.totalorder %s256_s29, %s256_s29 }
  0x21   : > { %p259_p8 = pnand %p257_p7, %p245_p0  ;;  %p266_p5 = por %p265_p6, %p264_p9 }
  0x23   : > { %p260_p11 = pneg %p259_p8 }
  0x25   : > { %p267_p10 = pnand %p266_p5, %p260_p11 }
  0x27   : > { %270 = shalt.err (!%p267_p10)
}
  0x28   : > { %202 = dma.hbm_to_vmem [thread:$0]  (!%p408_p12), %s481_s0, 128, %s81_s20, [#allocation3]  }
  0x29   : > { %p490_p13 = scmp.ne.s32.totalorder %s488_s18, 0 }
  0x2a   : > { %p491_p1 = scmp.eq.s32.totalorder (!%p490_p13), %s372_s10, 0 }
  0x2b   : > { %93 = sbr.rel (%p490_p13) target bundleno = 77 (0x4d), region = 24 }
  0x32   : > { %316 = dma.done.wait (%p491_p1), [#allocation3], 128   ;;  %p492_p0 = pmov %p491_p1 }
  0x33   : > { %s105_s3 = sand.u32 1, %s329_s7   ;;  %s190_s13 = sshll.u32 %s372_s10, 7  ;;  %v108_v0 = vld [vmem:[#allocation2] sm:$0xff] }
  0x34   : > { %318 = vsyncadd (%p492_p0), [#allocation3], 4294967168  ;;  %s188_s4 = sshll.u32 %s105_s3, 3  ;;  %s441_s18 = scalar_lea.hbm %s482_s1, %s190_s13 }
  0x35   : > { %s107_s5 = scalar_lea.vmem [#allocation5], %s188_s4  ;;  %s111_s20 = scalar_lea.sflag [#allocation4], %s105_s3 }
  0x36   : > { %s124_s11 = sshll.u32 %s107_s5, 4  ;;  %109 = vst [vmem:[%s107_s5] sm:$0xff] %v108_v0  ;;  %p493_p6 = scmp.ne.s32.totalorder %s486_s16, 0  ;;  %s436_s11 = int_to_ptr.vmem [resolvable:$true] %s124_s11 }
  0x37   : > { %s271_s21 = scalar_lea.vmem %s436_s11, 128  ;;  %s340_s22 = smov [#allocation5]  }
  0x38   : > { %p272_p5 = scmp.ne.s32.totalorder %s436_s11, %s271_s21  ;;  %s275_s10 = sshll.u32 %s340_s22, 4  ;;  %s276_s10 = int_to_ptr.vmem [resolvable:$false] %s275_s10 }
  0x39   : > { %s277_s23 = scalar_lea.vmem %s276_s10, 256  ;;  %p278_p12 = scmp.lt.s32.totalorder %s436_s11, %s276_s10 }
  0x3a   : > { %p273_p9 = pnand %p272_p5, %p493_p6  ;;  %p279_p2 = scmp.lt.s32.totalorder %s277_s23, %s271_s21 }
  0x3c   : > { %p274_p10 = pneg %p273_p9  ;;  %p280_p3 = por %p279_p2, %p278_p12 }
  0x3e   : > { %p281_p4 = pnand %p280_p3, %p274_p10 }
  0x40   : > { %284 = shalt.err (!%p281_p4)
}
  0x41   : > { %s285_s24 = scalar_lea.hbm %s441_s18, 128  ;;  %s289_s27 = scalar_lea.hbm %s482_s1, 256 }
  0x42   : > { %p286_p7 = scmp.ne.s32.totalorder %s441_s18, %s285_s24  ;;  %p290_p13 = scmp.lt.u32.totalorder %s441_s18, %s482_s1 }
  0x43   : > { %p291_p1 = scmp.lt.u32.totalorder %s289_s27, %s285_s24  ;;  %p293_p5 = scmp.lt.u32.totalorder %s285_s24, %s441_s18 }
  0x44   : > { %p287_p8 = pnand %p286_p7, %p493_p6 }
  0x45   : > { %p292_p0 = por %p291_p1, %p290_p13 }
  0x46   : > { %p288_p11 = pneg %p287_p8 }
  0x47   : > { %p294_p9 = por %p293_p5, %p292_p0 }
  0x49   : > { %p295_p10 = pnand %p294_p9, %p288_p11 }
  0x4b   : > { %298 = shalt.err (!%p295_p10)
}
  0x4c   : > { %197 = dma.vmem_to_hbm [thread:$0]  (%p493_p6), %s436_s11, 128, %s441_s18, %s111_s20  }
  0x4d PF: > { %p209_p12 = scmp.ge.s32.totalorder %s337_s9, 2  ;;  %s136_s30 = sand.u32 1, %s325_s6  }
  0x4e   : > { %p494_p2 = scmp.ne.s32.totalorder %s487_s17, 0  ;;  %s137_s2 = scalar_lea.sflag [#allocation4], %s136_s30 }
  0x50   : > { %p204_p3 = pnand %p209_p12, %p494_p2 }
  0x52   : > { %320 = dma.done.wait (!%p204_p3), %s137_s2, 128  }
  0x53   : > { %322 = vsyncadd (!%p204_p3), %s137_s2, 4294967168  ;;  %p12_p4 = scmp.ge.s32.totalorder %s376_s12, 4   ;;  %s495_s6 = smov %s329_s7 }
  0x54   : > { %s496_s7 = smov %s333_s8  ;;  %s497_s8 = smov %s387_s15 }
  0x55   : > { %s498_s9 = smov %s376_s12  ;;  %14 = sbr.rel (!%p12_p4) target bundleno = 4 (0x4), region = 61 }
  0x5c   :  { %142 = vsyncpa [#allocation3], 1 }
  0x5d   :  { %144 = vsyncpa [#allocation3 + $0x1], 1 }
  0x5e   :  { %145 = vsyncpa [#allocation4], 1 }
  0x5f   :  { %147 = vsyncpa [#allocation4 + $0x1], 1 }

// kernel: tpu_custom_call.1
= control target key start
LH: loop header
LB: loop body
LE: loop exit
PB: predicated region body
PF: predicated region fallthrough
CT: control target
= control target key end

     0   :  { %13 = vsyncpa [#allocation3], 0  ;;  %s2612_s0 = inlined_call_operand.vmem [shape: f32[512,1], index: 0, kind: input, shape index: {}]   ;;  %s2613_s1 = inlined_call_operand.hbm [shape: f32[512,256], index: 1, kind: input, shape index: {}]   ;;  %s2614_s2 = inlined_call_operand.vmem [shape: f32[4,128], index: 2, kind: input, shape index: {}]   ;;  %s2615_s3 = inlined_call_operand.vmem [shape: f32[4,128], index: 3, kind: input, shape index: {}]   ;;  %s2616_s4 = inlined_call_operand.vmem [shape: f32[128,128], index: 4, kind: input, shape index: {}]   ;;  %s2617_s5 = inlined_call_operand.vmem [shape: f32[128,128], index: 5, kind: input, shape index: {}]   ;;  %s2618_s6 = inlined_call_operand.vmem [shape: f32[128,128], index: 6, kind: input, shape index: {}]   ;;  %s2619_s7 = inlined_call_operand.vmem [shape: f32[1,128], index: 7, kind: input, shape index: {}]   ;;  %s2620_s8 = inlined_call_operand.hbm [shape: f32[512,128], index: 8, kind: output, shape index: {}]  }
   0x1   :  { %15 = vsyncpa [#allocation3 + $0x1], 0 }
   0x2   :  { %16 = vsyncpa [#allocation4], 0 }
   0x3   :  { %18 = vsyncpa [#allocation4 + $0x1], 0  ;;  %s1940_s27 = smov 0   ;;  %s1942_s28 = smov 0  }
   0x4   :  { %s1944_s29 = smov 0   ;;  %s1946_s30 = smov 0  }
   0x5 LB: > { %s1961_s9 = sadd.s32 4294967295, %s1885_s30   ;;  %s1330_s10 = sadd.s32 4294967294, %s1885_s30   ;;  %s1885_s30 = sphi %s1946_s30, %s2635_s30   ;;  %s1881_s29 = sphi %s1944_s29, %s2634_s29   ;;  %s1877_s28 = sphi %s1942_s28, %s2633_s28   ;;  %s1873_s27 = sphi %s1940_s27, %s2632_s27  }
   0x6   : > { %s1965_s11 = sadd.s32 1, %s1885_s30   ;;  %s57_s12 = sadd.s32 1, %s1881_s29 }
   0x7   : > { %s54_s13 = ssub.s32 %s1885_s30, %s1965_s11  ;;  %p64_p0 = scmp.ne.s32.totalorder %s1881_s29, %s1877_s28 }
   0x8   : > { %p55_p1 = scmp.eq.s32.totalorder %s54_s13, 0  ;;  %p65_p2 = scmp.eq.s32.totalorder %s1885_s30, 0 }
   0x9   : > { %p70_p3 = scmp.ne.s32.totalorder %s1877_s28, %s1873_s27  ;;  %p71_p4 = scmp.eq.s32.totalorder %s1961_s9, 0 }
   0xa   : > { %s1977_s14 = scalar_select %p55_p1, %s1881_s29, %s57_s12  }
   0xb   : > { %p1979_p5 = por %p65_p2, %p64_p0  ;;  %p1983_p6 = por %p71_p4, %p70_p3 }
   0xc   : > { %p220_p7 = scmp.eq.s32.totalorder %s1961_s9, 3  ;;  %p226_p8 = scmp.eq.s32.totalorder %s1330_s10, 3 }
   0xd   : > { %p1747_p9 = scmp.lt.s32.totalorder %s1885_s30, 4  ;;  %s273_s19 = sand.u32 1, %s1881_s29  }
   0xe   : > { %p1989_p10 = por %p220_p7, %p64_p0  ;;  %p1993_p11 = por %p226_p8, %p70_p3 }
   0xf   : > { %s1357_s20 = sshll.u32 %s1885_s30, 12  ;;  %s1333_s21 = sshll.u32 %s273_s19, 7 }
  0x10   : > { %s2625_s17 = scalar_select %p1989_p10, 1, 0 }
  0x11   : > { %s2626_s18 = scalar_select %p1993_p11, 1, 0 }
  0x12   : > { %s2002_s24 = scalar_lea.hbm %s2613_s1, %s1357_s20  ;;  %s277_s25 = scalar_lea.vmem [#allocation2], %s1333_s21 }
  0x13   : > { %s285_s26 = sshll.u32 %s277_s25, 4  ;;  %p2006_p12 = pnand %p1747_p9, %p1979_p5  ;;  %s2010_s26 = int_to_ptr.vmem [resolvable:$true] %s285_s26 }
  0x14   : > { %s2013_s12 = scalar_lea.sflag [#allocation3], %s273_s19  ;;  %s1789_s13 = scalar_lea.hbm %s2002_s24, 2048 }
  0x15   : > { %p1790_p0 = scmp.ne.s32.totalorder %s2002_s24, %s1789_s13  ;;  %p1791_p1 = pneg %p2006_p12 }
  0x16   : > { %s1794_s21 = scalar_lea.hbm %s2613_s1, 16384  ;;  %p1795_p4 = scmp.lt.u32.totalorder %s2002_s24, %s2613_s1 }
  0x17   : > { %p1792_p2 = pnand %p1791_p1, %p1790_p0  ;;  %p1796_p5 = scmp.lt.u32.totalorder %s1794_s21, %s1789_s13 }
  0x18   : > { %p1798_p8 = scmp.lt.u32.totalorder %s1789_s13, %s2002_s24 }
  0x19   : > { %p1793_p3 = pneg %p1792_p2  ;;  %p1797_p7 = por %p1796_p5, %p1795_p4 }
  0x1b   : > { %p1799_p9 = por %p1798_p8, %p1797_p7 }
  0x1d   : > { %p1800_p13 = pnand %p1799_p9, %p1793_p3 }
  0x1f   : > { %1803 = shalt.err (!%p1800_p13)
}
  0x20   : > { %s1804_s19 = scalar_lea.vmem %s2010_s26, 2048  ;;  %s1887_s25 = smov [#allocation2]  }
  0x21   : > { %p1805_p0 = scmp.ne.s32.totalorder %s2010_s26, %s1804_s19  ;;  %s1809_s15 = sshll.u32 %s1887_s25, 4  ;;  %s1810_s15 = int_to_ptr.vmem [resolvable:$false] %s1809_s15 }
  0x22   : > { %s1811_s20 = scalar_lea.vmem %s1810_s15, 4096  ;;  %p1812_p10 = scmp.lt.s32.totalorder %s2010_s26, %s1810_s15 }
  0x23   : > { %p1807_p2 = pnand %p1805_p0, %p1791_p1  ;;  %p1813_p4 = scmp.lt.s32.totalorder %s1811_s20, %s1804_s19 }
  0x25   : > { %p1808_p11 = pneg %p1807_p2  ;;  %p1814_p5 = por %p1813_p4, %p1812_p10 }
  0x27   : > { %p1815_p7 = pnand %p1814_p5, %p1808_p11 }
  0x29   : > { %1818 = shalt.err (!%p1815_p7)
}
  0x2a   : > { %s1888_s13 = smov 256   ;;  %s1889_s21 = smov 128  }
  0x2b   : > { %s1890_s22 = smov 8   ;;  %p293_p13 = scmp.lt.s32.totalorder %s1885_s30, 5 }
  0x2c   : > { %1742 = dma.hbm_to_vmem [thread:$0]  (!%p2006_p12), %s2002_s24, 2048, %s2010_s26, %s2013_s12, %s1888_s13, %s1889_s21, %s1890_s22  }
  0x2d   : > { %p2628_p1 = scmp.ge.s32.totalorder %s1885_s30, 1 }
  0x2f   : > { %p294_p3 = pnand %p2628_p1, %p293_p13 }
  0x30   : > { %s2045_s23 = sand.u32 (!%p294_p3), 1, %s1877_s28  }
  0x31   : > { %297 = sbr.rel (%p294_p3) target bundleno = 790 (0x316), region = 52  ;;  %s2622_s19 = sshll.u32 (!%p294_p3), %s2045_s23, 7 }
  0x32   : > { %s300_s25 = scalar_lea.sflag (!%p294_p3), [#allocation3], %s2045_s23  ;;  %s2051_s15 = scalar_lea.vmem (!%p294_p3), [#allocation2], %s2622_s19 }
  0x38   : > { %1864 = dma.done.wait (%p1983_p6), %s300_s25, 2048  }
  0x39   : > { %1866 = vsyncadd (%p1983_p6), %s300_s25, 4294965248  ;;  %s1340_s24 = sshll.u32 %s1961_s9, 4  ;;  %v1891_v0 = vmov 0   ;;  %v545_v1 = vld [vmem:[%s2616_s4] sm:$0xff]  ;;  %v546_v2 = vld [vmem:[%s2616_s4 + $0x8] sm:$0xff]  ;;  %s2629_s19 = sshll.u32 %s2045_s23, 7 }
  0x3a   : > { %1787 = vset.pattern.permute.xlu0 %v1891_v0  ;;  %1788 = vset.pattern.permute.xlu1 %v1891_v0  ;;  %p342_p10 = scmp.lt.s32.totalorder %s1340_s24, 63  ;;  %v547_v3 = vld [vmem:[%s2616_s4 + $0x10] sm:$0xff]  ;;  %v1623_v4 = vpack.c.bf16 %v546_v2, %v545_v1  ;;  %v548_v5 = vld [vmem:[%s2616_s4 + $0x18] sm:$0xff]  ;;  %v549_v7 = vld [vmem:[%s2616_s4 + $0x20] sm:$0xff]  ;;  %s2544_s22 = scalar_lea.vmem [#allocation5], %s2629_s19 }
  0x3b   : > { %v1627_v6 = vpack.c.bf16 %v548_v5, %v547_v3  ;;  %v550_v8 = vld [vmem:[%s2616_s4 + $0x28] sm:$0xff]  ;;  %v529_v10 = vld [vmem:[%s2051_s15] sm:$0xff]  ;;  %v551_v11 = vld [vmem:[%s2616_s4 + $0x30] sm:$0xff]  ;;  %p2630_p11 = scmp.ne.s32.totalorder %s2625_s17, 0  ;;  %s1892_s13 = smov [#allocation5]  }
  0x3c   : > { %s2637_s24 = smov (!%p342_p10, %s1340_s24), 63  ;;  %1624 = vmatprep.subr.bf16.mxu0 %v1623_v4  ;;  %v1631_v9 = vpack.c.bf16 %v550_v8, %v549_v7  ;;  %v552_v12 = vld [vmem:[%s2616_s4 + $0x38] sm:$0xff]  ;;  %1487 = vmatprep.mubr.f32.mxu0 %v529_v10  ;;  %v553_v14 = vld [vmem:[%s2616_s4 + $0x40] sm:$0xff]  ;;  %v554_v15 = vld [vmem:[%s2616_s4 + $0x48] sm:$0xff]  ;;  %s1823_s21 = sshll.u32 %s1892_s13, 4  ;;  %s1824_s21 = int_to_ptr.vmem [resolvable:$false] %s1823_s21 }
  0x3d   : > { %1626 = vmatpush3.bf16.msra.mxu0 %v1623_v4  ;;  %s1341_s12 = sshll.u32 %s2637_s24, 3  ;;  %v1635_v13 = vpack.c.bf16 %v552_v12, %v551_v11  ;;  %v1639_v19 = vpack.c.bf16 %v554_v15, %v553_v14  ;;  %v555_v21 = vld [vmem:[%s2616_s4 + $0x50] sm:$0xff]  ;;  %v556_v22 = vld [vmem:[%s2616_s4 + $0x58] sm:$0xff]  ;;  %v557_v26 = vld [vmem:[%s2616_s4 + $0x60] sm:$0xff]  ;;  %s1245_s24 = sshll.u32 %s2544_s22, 4  ;;  %s2567_s24 = int_to_ptr.vmem [resolvable:$true] %s1245_s24 }
  0x3e   : > { %1628 = vmatprep.subr.bf16.mxu0 %v1627_v6  ;;  %s2086_s25 = scalar_lea.vmem %s2612_s0, %s1341_s12  ;;  %v1643_v24 = vpack.c.bf16 %v556_v22, %v555_v21  ;;  %v558_v27 = vld [vmem:[%s2616_s4 + $0x68] sm:$0xff]  ;;  %v838_v28 = vld [vmem:[%s2617_s5] sm:$0xff]  ;;  %v559_v34 = vld [vmem:[%s2616_s4 + $0x70] sm:$0xff]  ;;  %s1819_s12 = scalar_lea.vmem %s2567_s24, 2048 }
  0x3f   : > { %v349_v16 = vld [vmem:[%s2086_s25] sm:$0xff]  ;;  %v351_v17 = vld [vmem:[%s2086_s25 + $0x10] sm:$0xff]  ;;  %v350_v18 = vld [vmem:[%s2086_s25 + $0x8] sm:$0xff]  ;;  %v1647_v32 = vpack.c.bf16 %v558_v27, %v557_v26  ;;  %p1820_p6 = scmp.ne.s32.totalorder %s2567_s24, %s1819_s12  ;;  %p1826_p9 = scmp.lt.s32.totalorder %s2567_s24, %s1824_s21 }
  0x40   : > { %368 = vperm.xlu0 %1787, %v349_v16   ;;  %378 = vperm.xlu1 %1788, %v351_v17   ;;  %v352_v20 = vld [vmem:[%s2086_s25 + $0x18] sm:$0xff]  ;;  %v353_v23 = vld [vmem:[%s2086_s25 + $0x20] sm:$0xff]  ;;  %v354_v25 = vld [vmem:[%s2086_s25 + $0x28] sm:$0xff] }
  0x41   : > { %1630 = vmatpush3.bf16.msra.mxu0 %v1627_v6  ;;  %v839_v29 = vld [vmem:[%s2617_s5 + $0x8] sm:$0xff]  ;;  %v355_v30 = vld [vmem:[%s2086_s25 + $0x30] sm:$0xff]  ;;  %v356_v33 = vld [vmem:[%s2086_s25 + $0x38] sm:$0xff]  ;;  %p1821_p12 = pnand %p1820_p6, %p2630_p11 }
  0x42   : > { %1632 = vmatprep.subr.bf16.mxu0 %v1631_v9  ;;  %v1655_v31 = vpack.c.bf16 %v839_v29, %v838_v28  ;;  %v560_v35 = vld [vmem:[%s2616_s4 + $0x78] sm:$0xff]  ;;  %v840_v36 = vld [vmem:[%s2617_s5 + $0x10] sm:$0xff]  ;;  %v357_v38 = vld [vmem:[%s2086_s25 + $0x40] sm:$0xff] }
  0x43   : > { %v841_v37 = vld [vmem:[%s2617_s5 + $0x18] sm:$0xff]  ;;  %v1651_v40 = vpack.c.bf16 %v560_v35, %v559_v34  ;;  %v358_v41 = vld [vmem:[%s2086_s25 + $0x48] sm:$0xff]  ;;  %v842_v42 = vld [vmem:[%s2617_s5 + $0x20] sm:$0xff]  ;;  %p1822_p8 = pneg %p1821_p12 }
  0x44   : > { %373 = vperm.xlu0 %1787, %v350_v18   ;;  %383 = vperm.xlu1 %1788, %v352_v20   ;;  %v1659_v39 = vpack.c.bf16 %v841_v37, %v840_v36  ;;  %v843_v43 = vld [vmem:[%s2617_s5 + $0x28] sm:$0xff]  ;;  %v359_v44 = vld [vmem:[%s2086_s25 + $0x50] sm:$0xff]  ;;  %v360_v46 = vld [vmem:[%s2086_s25 + $0x58] sm:$0xff] }
  0x45   : > { %1634 = vmatpush3.bf16.msra.mxu0 %v1631_v9  ;;  %1656 = vmatprep.subr.bf16.mxu1 %v1655_v31  ;;  %v1663_v45 = vpack.c.bf16 %v843_v43, %v842_v42  ;;  %v844_v47 = vld [vmem:[%s2617_s5 + $0x30] sm:$0xff]  ;;  %v845_v48 = vld [vmem:[%s2617_s5 + $0x38] sm:$0xff]  ;;  %v530_v49 = vld [vmem:[%s2051_s15 + $0x8] sm:$0xff] }
  0x46   : > { %1636 = vmatprep.subr.bf16.mxu0 %v1635_v13  ;;  %1658 = vmatpush3.bf16.msra.mxu1 %v1655_v31  ;;  %v361_v50 = vld [vmem:[%s2086_s25 + $0x60] sm:$0xff]  ;;  %v1667_v51 = vpack.c.bf16 %v845_v48, %v844_v47  ;;  %v531_v52 = vld [vmem:[%s2051_s15 + $0x10] sm:$0xff]  ;;  %v362_v53 = vld [vmem:[%s2086_s25 + $0x68] sm:$0xff] }
  0x47   : > { %1660 = vmatprep.subr.bf16.mxu1 %v1659_v39  ;;  %v846_v54 = vld [vmem:[%s2617_s5 + $0x40] sm:$0xff]  ;;  %v847_v55 = vld [vmem:[%s2617_s5 + $0x48] sm:$0xff]  ;;  %v532_v56 = vld [vmem:[%s2051_s15 + $0x18] sm:$0xff] }
  0x48   : > { %388 = vperm.xlu0 %1787, %v353_v23   ;;  %393 = vperm.xlu1 %1788, %v354_v25   ;;  %v363_v57 = vld [vmem:[%s2086_s25 + $0x70] sm:$0xff]  ;;  %v1671_v58 = vpack.c.bf16 %v847_v55, %v846_v54  ;;  %v533_v59 = vld [vmem:[%s2051_s15 + $0x20] sm:$0xff]  ;;  %v364_v60 = vld [vmem:[%s2086_s25 + $0x78] sm:$0xff]  ;;  %s1358_s25 = sshll.u32 %s1961_s9, 11  ;;  %s1232_s9 = scalar_lea.sflag [#allocation4], %s2045_s23 }
  0x49   : > { %1638 = vmatpush3.bf16.msra.mxu0 %v1635_v13  ;;  %v848_v61 = vld [vmem:[%s2617_s5 + $0x50] sm:$0xff]  ;;  %v849_v62 = vld [vmem:[%s2617_s5 + $0x58] sm:$0xff]  ;;  %v534_v63 = vld [vmem:[%s2051_s15 + $0x28] sm:$0xff]  ;;  %s2565_s20 = scalar_lea.hbm %s2620_s8, %s1358_s25 }
  0x4a   : > { %1640 = vmatprep.subr.bf16.mxu0 %v1639_v19  ;;  %1662 = vmatpush3.bf16.msra.mxu1 %v1659_v39  ;;  %v1675_v0 = vpack.c.bf16 %v849_v62, %v848_v61  ;;  %v535_v1 = vld [vmem:[%s2051_s15 + $0x30] sm:$0xff]  ;;  %v536_v2 = vld [vmem:[%s2051_s15 + $0x38] sm:$0xff]  ;;  %v537_v3 = vld [vmem:[%s2051_s15 + $0x40] sm:$0xff] }
  0x4b   : > { %1664 = vmatprep.subr.bf16.mxu1 %v1663_v45  ;;  %v538_v4 = vld [vmem:[%s2051_s15 + $0x48] sm:$0xff]  ;;  %v539_v5 = vld [vmem:[%s2051_s15 + $0x50] sm:$0xff]  ;;  %v540_v6 = vld [vmem:[%s2051_s15 + $0x58] sm:$0xff] }
  0x4c   : > { %398 = vperm.xlu0 %1787, %v355_v30   ;;  %403 = vperm.xlu1 %1788, %v356_v33   ;;  %v541_v7 = vld [vmem:[%s2051_s15 + $0x60] sm:$0xff]  ;;  %v542_v8 = vld [vmem:[%s2051_s15 + $0x68] sm:$0xff]  ;;  %v543_v9 = vld [vmem:[%s2051_s15 + $0x70] sm:$0xff] }
  0x4d   : > { %1642 = vmatpush3.bf16.msra.mxu0 %v1639_v19  ;;  %v544_v10 = vld [vmem:[%s2051_s15 + $0x78] sm:$0xff]  ;;  %v850_v11 = vld [vmem:[%s2617_s5 + $0x60] sm:$0xff]  ;;  %v851_v12 = vld [vmem:[%s2617_s5 + $0x68] sm:$0xff]  ;;  %s1825_s15 = scalar_lea.vmem %s1824_s21, 4096 }
  0x4e   : > { %1644 = vmatprep.subr.bf16.mxu0 %v1643_v24  ;;  %1666 = vmatpush3.bf16.msra.mxu1 %v1663_v45  ;;  %v1679_v13 = vpack.c.bf16 %v851_v12, %v850_v11  ;;  %v852_v14 = vld [vmem:[%s2617_s5 + $0x70] sm:$0xff]  ;;  %v853_v15 = vld [vmem:[%s2617_s5 + $0x78] sm:$0xff]  ;;  %v1047_v17 = vld [vmem:[%s2618_s6] sm:$0xff]  ;;  %p1827_p0 = scmp.lt.s32.totalorder %s1825_s15, %s1819_s12 }
  0x4f   : > { %1668 = vmatprep.subr.bf16.mxu1 %v1667_v51  ;;  %v1683_v16 = vpack.c.bf16 %v853_v15, %v852_v14  ;;  %v1048_v18 = vld [vmem:[%s2618_s6 + $0x8] sm:$0xff]  ;;  %v1049_v19 = vld [vmem:[%s2618_s6 + $0x10] sm:$0xff]  ;;  %v1050_v21 = vld [vmem:[%s2618_s6 + $0x18] sm:$0xff] }
  0x50   : > { %408 = vperm.xlu0 %1787, %v357_v38   ;;  %413 = vperm.xlu1 %1788, %v358_v41   ;;  %v2200_v20 = vpack.c.bf16 %v1048_v18, %v1047_v17  ;;  %v2205_v22 = vpack.c.bf16 %v1050_v21, %v1049_v19  ;;  %v1051_v23 = vld [vmem:[%s2618_s6 + $0x20] sm:$0xff]  ;;  %v1053_v26 = vld [vmem:[%s2618_s6 + $0x30] sm:$0xff]  ;;  %v1054_v27 = vld [vmem:[%s2618_s6 + $0x38] sm:$0xff]  ;;  %p1828_p2 = por %p1827_p0, %p1826_p9 }
  0x51   : > { %1646 = vmatpush3.bf16.msra.mxu0 %v1643_v24  ;;  %v1052_v24 = vld [vmem:[%s2618_s6 + $0x28] sm:$0xff]  ;;  %v2227_v28 = vpack.c.bf16 %v1054_v27, %v1053_v26  ;;  %v1055_v29 = vld [vmem:[%s2618_s6 + $0x40] sm:$0xff]  ;;  %v1058_v33 = vld [vmem:[%s2618_s6 + $0x58] sm:$0xff] }
  0x52   : > { %1648 = vmatprep.subr.bf16.mxu0 %v1647_v32  ;;  %1670 = vmatpush3.bf16.msra.mxu1 %v1667_v51  ;;  %v2217_v25 = vpack.c.bf16 %v1052_v24, %v1051_v23  ;;  %v1056_v30 = vld [vmem:[%s2618_s6 + $0x48] sm:$0xff]  ;;  %v2267_v41 = vld [vmem:[%s2614_s2] ss:$0 sm:$0xff]  ;;  %v2272_v42 = vld [vmem:[%s2614_s2 + $0x1] ss:$0 sm:$0xff]  ;;  %p1829_p4 = pnand %p1828_p2, %p1822_p8 }
  0x53   : > { %1672 = vmatprep.subr.bf16.mxu1 %v1671_v58  ;;  %v2237_v31 = vpack.c.bf16 %v1056_v30, %v1055_v29  ;;  %v2281_v45 = vld [vmem:[%s2615_s3] ss:$0 sm:$0xff] }
  0x54   : > { %418 = vperm.xlu0 %1787, %v359_v44   ;;  %423 = vperm.xlu1 %1788, %v360_v46  }
  0x55   : > { %1650 = vmatpush3.bf16.msra.mxu0 %v1647_v32  ;;  %v1057_v32 = vld [vmem:[%s2618_s6 + $0x50] sm:$0xff] }
  0x56   : > { %1652 = vmatprep.subr.bf16.mxu0 %v1651_v40  ;;  %1674 = vmatpush3.bf16.msra.mxu1 %v1671_v58  ;;  %v2247_v34 = vpack.c.bf16 %v1058_v33, %v1057_v32 }
  0x57   : > { %1676 = vmatprep.subr.bf16.mxu1 %v1675_v0 }
  0x58   : > { %428 = vperm.xlu0 %1787, %v361_v50   ;;  %433 = vperm.xlu1 %1788, %v362_v53  }
  0x59   : > { %1654 = vmatpush3.bf16.msra.mxu0 %v1651_v40 }
  0x5a   : > { %1678 = vmatpush3.bf16.msra.mxu1 %v1675_v0  ;;  %1688 = vmatprep.subr.bf16.mxu0 %v2200_v20 }
  0x5b   : > { %1680 = vmatprep.subr.bf16.mxu1 %v1679_v13 }
  0x5c   : > { %1488 = vmatmul.mubr.f32.vlgmr.msra.gmra.mrb[0].mxu0 %v530_v49  ;;  %438 = vperm.xlu0 %1787, %v363_v57   ;;  %v2292_v49 = vld [vmem:[%s2615_s3 + $0x1] ss:$0 sm:$0xff] }
  0x5d   : > { %1490 = vmatprep.mubr.f32.mxu0 %v531_v52  ;;  %443 = vperm.xlu1 %1788, %v364_v60  }
  0x5e   : > { %1682 = vmatpush3.bf16.msra.mxu1 %v1679_v13  ;;  %1690 = vmatpush3.bf16.msra.mxu0 %v2200_v20 }
  0x5f   : > { %1684 = vmatprep.subr.bf16.mxu1 %v1683_v16  ;;  %1692 = vmatprep.subr.bf16.mxu0 %v2205_v22 }
  0x60   : > { %1491 = vmatmul.mubr.f32.gmra.mrb[2].mxu0 %v532_v56 }
  0x61   : > { %1493 = vmatprep.mubr.f32.mxu0 %v533_v59 }
  0x62   : > { %1686 = vmatpush3.bf16.msra.mxu1 %v1683_v16  ;;  %1694 = vmatpush3.bf16.msra.mxu0 %v2205_v22 }
  0x63   : > { %1719 = vmatprep.subr.bf16.mxu1 %v2200_v20  ;;  %1696 = vmatprep.subr.bf16.mxu0 %v2217_v25 }
  0x64   : > { %1494 = vmatmul.mubr.f32.gmra.mrb[4].mxu0 %v534_v63 }
  0x65   : > { %1496 = vmatprep.mubr.f32.mxu0 %v535_v1 }
  0x66   : > { %1698 = vmatpush3.bf16.msra.mxu0 %v2217_v25 }
  0x67   : > { %1700 = vmatprep.subr.bf16.mxu0 %v2227_v28 }
  0x68   : > { %1497 = vmatmul.mubr.f32.gmra.mrb[6].mxu0 %v536_v2 }
  0x69   : > { %1499 = vmatprep.mubr.f32.mxu0 %v537_v3 }
  0x6a   : > { %1702 = vmatpush3.bf16.msra.mxu0 %v2227_v28 }
  0x6b   : > { %1704 = vmatprep.subr.bf16.mxu0 %v2237_v31 }
  0x6c   : > { %1500 = vmatmul.mubr.f32.gmra.mrb[8].mxu0 %v538_v4 }
  0x6d   : > { %1502 = vmatprep.mubr.f32.mxu0 %v539_v5 }
  0x6e   : > { %1706 = vmatpush3.bf16.msra.mxu0 %v2237_v31 }
  0x6f   : > { %1708 = vmatprep.subr.bf16.mxu0 %v2247_v34 }
  0x70   : > { %1503 = vmatmul.mubr.f32.gmra.mrb[10].mxu0 %v540_v6 }
  0x71   : > { %1505 = vmatprep.mubr.f32.mxu0 %v541_v7 }
  0x72   : > { %1710 = vmatpush3.bf16.msra.mxu0 %v2247_v34 }
  0x74   : > { %1506 = vmatmul.mubr.f32.gmra.mrb[12].mxu0 %v542_v8 }
  0x75   : > { %1508 = vmatprep.mubr.f32.mxu0 %v543_v9 }
  0x78   : > { %1509 = vmatmul.mubr.f32.gmra.mrb[14].mxu0 %v544_v10 }
  0xbf   : > { %v2252_v35 = vpop.permute.xlu1 %378  ;;  %v2254_v36 = vpop.permute.xlu0 %368 }
  0xc0   : > { %v450_v46 = vmul.f32 %v2267_v41, %v2254_v36  ;;  %v492_v50 = vmul.f32 %v2272_v42, %v2254_v36  ;;  %v452_v55 = vmul.f32 %v2267_v41, %v2252_v35  ;;  %v494_v60 = vmul.f32 %v2272_v42, %v2252_v35 }
  0xc2   : > { %v471_v54 = vadd.f32 %v2281_v45, %v450_v46  ;;  %v513_v63 = vadd.f32 %v2292_v49, %v492_v50  ;;  %v473_v5 = vadd.f32 %v2281_v45, %v452_v55  ;;  %v515_v13 = vadd.f32 %v2292_v49, %v494_v60 }
  0xc3   : > { %v2256_v37 = vpop.permute.xlu1 %383  ;;  %v2258_v38 = vpop.permute.xlu0 %373 }
  0xc4   : > { %v451_v43 = vmul.f32 %v2267_v41, %v2258_v38  ;;  %v493_v47 = vmul.f32 %v2272_v42, %v2258_v38  ;;  %v453_v52 = vmul.f32 %v2267_v41, %v2256_v37  ;;  %v495_v56 = vmul.f32 %v2272_v42, %v2256_v37 }
  0xc6   : > { %v472_v51 = vadd.f32 %v2281_v45, %v451_v43  ;;  %v514_v57 = vadd.f32 %v2292_v49, %v493_v47  ;;  %v474_v2 = vadd.f32 %v2281_v45, %v453_v52  ;;  %v516_v9 = vadd.f32 %v2292_v49, %v495_v56 }
  0xc7   : > { %v2260_v39 = vpop.permute.xlu1 %393  ;;  %v2262_v40 = vpop.permute.xlu0 %388 }
  0xc8   : > { %v455_v3 = vmul.f32 %v2267_v41, %v2260_v39  ;;  %v454_v7 = vmul.f32 %v2267_v41, %v2262_v40  ;;  %v497_v8 = vmul.f32 %v2272_v42, %v2260_v39  ;;  %v496_v12 = vmul.f32 %v2272_v42, %v2262_v40 }
  0xca   : > { %v476_v18 = vadd.f32 %v2281_v45, %v455_v3  ;;  %v475_v26 = vadd.f32 %v2281_v45, %v454_v7  ;;  %v518_v32 = vadd.f32 %v2292_v49, %v497_v8  ;;  %v517_v50 = vadd.f32 %v2292_v49, %v496_v12 }
  0xcb   : > { %v2276_v44 = vpop.permute.xlu1 %403  ;;  %v2287_v48 = vpop.permute.xlu0 %398 }
  0xcc   : > { %v457_v19 = vmul.f32 %v2267_v41, %v2276_v44  ;;  %v456_v27 = vmul.f32 %v2267_v41, %v2287_v48  ;;  %v499_v29 = vmul.f32 %v2272_v42, %v2276_v44  ;;  %v498_v46 = vmul.f32 %v2272_v42, %v2287_v48 }
  0xce   : > { %v520_v60 = vadd.f32 %v2292_v49, %v499_v29 }
  0xcf   : > { %v2307_v61 = vpop.permute.xlu1 %413  ;;  %v2310_v0 = vpop.permute.xlu0 %408 }
  0xd0   : > { %v459_v55 = vmul.f32 %v2267_v41, %v2307_v61 }
  0xd3   : > { %v2327_v21 = vpop.permute.xlu1 %423  ;;  %v2334_v30 = vpop.permute.xlu0 %418 }
 0x12f   : > { %v1489_v53 = vpop.f32.mrb[0].mxu0 }
 0x130   : > { %v707_v58 = vmul.f32 %v1489_v53, %v472_v51  ;;  %v627_v59 = vpop.f32.mrb[1].mxu0 }
 0x131   : > { %v706_v62 = vmul.f32 %v627_v59, %v471_v54  ;;  %v478_v54 = vadd.f32 %v2281_v45, %v457_v19  ;;  %v458_v59 = vmul.f32 %v2267_v41, %v2310_v0 }
 0x132   : > { %v723_v1 = vadd.f32 %v707_v58, %v514_v57  ;;  %v477_v58 = vadd.f32 %v2281_v45, %v456_v27 }
 0x133   : > { %v1492_v4 = vpop.f32.mrb[2].mxu0  ;;  %v722_v6 = vadd.f32 %v706_v62, %v513_v63 }
 0x134   : > { %v709_v10 = vmul.f32 %v1492_v4, %v474_v2  ;;  %v637_v11 = vpop.f32.mrb[3].mxu0  ;;  %v739_v16 = vmax.f32 %v723_v1, 0.0  ;;  %v500_v1 = vmul.f32 %v2272_v42, %v2310_v0  ;;  %v2353_v2 = vpop.permute.xlu1 %433  ;;  %v519_v4 = vadd.f32 %v2292_v49, %v498_v46 }
 0x135   : > { %v708_v14 = vmul.f32 %v637_v11, %v473_v5  ;;  %v738_v15 = vmax.f32 %v722_v6, 0.0  ;;  %v2357_v6 = vpop.permute.xlu0 %428 }
 0x136   : > { %v725_v17 = vadd.f32 %v709_v10, %v516_v9  ;;  %v480_v9 = vadd.f32 %v2281_v45, %v459_v55  ;;  %v461_v10 = vmul.f32 %v2267_v41, %v2327_v21  ;;  %v504_v55 = vmul.f32 %v2272_v42, %v2357_v6 }
 0x137   : > { %v724_v23 = vadd.f32 %v708_v14, %v515_v13  ;;  %v1495_v24 = vpop.f32.mrb[4].mxu0  ;;  %1543 = vmatprep.mubr.f32.mxu1 %v738_v15  ;;  %v479_v13 = vadd.f32 %v2281_v45, %v458_v59  ;;  %v460_v14 = vmul.f32 %v2267_v41, %v2334_v30 }
 0x138   : > { %v711_v33 = vmul.f32 %v1495_v24, %v476_v18  ;;  %v647_v43 = vpop.f32.mrb[5].mxu0  ;;  %1544 = vmatmul.mubr.f32.vlgmr.msra.gmra.mrb[0].mxu1 %v739_v16  ;;  %v741_v52 = vmax.f32 %v725_v17, 0.0  ;;  %v502_v18 = vmul.f32 %v2272_v42, %v2334_v30  ;;  %v482_v29 = vadd.f32 %v2281_v45, %v461_v10 }
 0x139   : > { %v740_v47 = vmax.f32 %v724_v23, 0.0  ;;  %v710_v51 = vmul.f32 %v647_v43, %v475_v26  ;;  %1727 = vmatpush3.bf16.msra.mxu1 %v2200_v20  ;;  %v501_v20 = vmul.f32 %v2272_v42, %v2307_v61  ;;  %v521_v23 = vadd.f32 %v2292_v49, %v500_v1 }
 0x13a   : > { %v727_v53 = vadd.f32 %v711_v33, %v518_v32  ;;  %1720 = vmatprep.subr.bf16.mxu1 %v2205_v22  ;;  %v463_v32 = vmul.f32 %v2267_v41, %v2353_v2  ;;  %v2377_v33 = vpop.permute.xlu1 %443 }
 0x13b   : > { %v726_v56 = vadd.f32 %v710_v51, %v517_v50  ;;  %v1498_v57 = vpop.f32.mrb[6].mxu0  ;;  %1546 = vmatprep.mubr.f32.mxu1 %v740_v47  ;;  %v522_v15 = vadd.f32 %v2292_v49, %v501_v20  ;;  %v481_v47 = vadd.f32 %v2281_v45, %v460_v14  ;;  %v462_v50 = vmul.f32 %v2267_v41, %v2357_v6  ;;  %v2384_v51 = vpop.permute.xlu0 %438 }
 0x13c   : > { %v713_v62 = vmul.f32 %v1498_v57, %v478_v54  ;;  %v657_v63 = vpop.f32.mrb[7].mxu0  ;;  %1547 = vmatmul.mubr.f32.gmra.mrb[2].mxu1 %v741_v52  ;;  %v743_v7 = vmax.f32 %v727_v53, 0.0  ;;  %v523_v57 = vadd.f32 %v2292_v49, %v502_v18  ;;  %v465_v59 = vmul.f32 %v2267_v41, %v2377_v33 }
 0x13d   : > { %v742_v3 = vmax.f32 %v726_v56, 0.0  ;;  %v712_v5 = vmul.f32 %v657_v63, %v477_v58  ;;  %1728 = vmatpush3.bf16.msra.mxu1 %v2205_v22  ;;  %v503_v22 = vmul.f32 %v2272_v42, %v2327_v21  ;;  %v464_v63 = vmul.f32 %v2267_v41, %v2384_v51 }
 0x13e   : > { %v729_v8 = vadd.f32 %v713_v62, %v520_v60  ;;  %1721 = vmatprep.subr.bf16.mxu1 %v2217_v25  ;;  %v484_v62 = vadd.f32 %v2281_v45, %v463_v32  ;;  %v486_v14 = vadd.f32 %v2281_v45, %v465_v59 }
 0x13f   : > { %v728_v11 = vadd.f32 %v712_v5, %v519_v4  ;;  %v1501_v12 = vpop.f32.mrb[8].mxu0  ;;  %1549 = vmatprep.mubr.f32.mxu1 %v742_v3  ;;  %v524_v52 = vadd.f32 %v2292_v49, %v503_v22  ;;  %v483_v4 = vadd.f32 %v2281_v45, %v462_v50  ;;  %v2426_v50 = vld [vmem:[%s2614_s2 + $0x2] ss:$0 sm:$0xff] }
 0x140   : > { %v715_v16 = vmul.f32 %v1501_v12, %v480_v9  ;;  %v667_v17 = vpop.f32.mrb[9].mxu0  ;;  %1550 = vmatmul.mubr.f32.gmra.mrb[4].mxu1 %v743_v7  ;;  %v745_v26 = vmax.f32 %v729_v8, 0.0  ;;  %v506_v9 = vmul.f32 %v2272_v42, %v2384_v51  ;;  %v762_v59 = vmul.f32 %v2426_v50, %v2256_v37 }
 0x141   : > { %v744_v19 = vmax.f32 %v728_v11, 0.0  ;;  %v714_v24 = vmul.f32 %v667_v17, %v479_v13  ;;  %1729 = vmatpush3.bf16.msra.mxu1 %v2217_v25  ;;  %v505_v25 = vmul.f32 %v2272_v42, %v2353_v2  ;;  %v525_v11 = vadd.f32 %v2292_v49, %v504_v55 }
 0x142   : > { %v731_v27 = vadd.f32 %v715_v16, %v522_v15  ;;  %1722 = vmatprep.subr.bf16.mxu1 %v2227_v28  ;;  %v485_v16 = vadd.f32 %v2281_v45, %v464_v63  ;;  %v1059_v45 = vld [vmem:[%s2618_s6 + $0x60] sm:$0xff] }
 0x143   : > { %v730_v43 = vadd.f32 %v714_v24, %v521_v23  ;;  %v1504_v46 = vpop.f32.mrb[10].mxu0  ;;  %1552 = vmatprep.mubr.f32.mxu1 %v744_v19  ;;  %v526_v5 = vadd.f32 %v2292_v49, %v505_v25  ;;  %v527_v23 = vadd.f32 %v2292_v49, %v506_v9  ;;  %v2431_v25 = vld [vmem:[%s2614_s2 + $0x3] ss:$0 sm:$0xff] }
 0x144   : > { %v717_v53 = vmul.f32 %v1504_v46, %v482_v29  ;;  %v677_v54 = vpop.f32.mrb[11].mxu0  ;;  %1553 = vmatmul.mubr.f32.gmra.mrb[6].mxu1 %v745_v26  ;;  %v747_v20 = vmax.f32 %v731_v27, 0.0  ;;  %v1062_v46 = vld [vmem:[%s2618_s6 + $0x78] sm:$0xff]  ;;  %v802_v55 = vmul.f32 %v2431_v25, %v2258_v38 }
 0x145   : > { %v746_v56 = vmax.f32 %v730_v43, 0.0  ;;  %v716_v58 = vmul.f32 %v677_v54, %v481_v47  ;;  %1730 = vmatpush3.bf16.msra.mxu1 %v2227_v28  ;;  %v507_v28 = vmul.f32 %v2272_v42, %v2377_v33  ;;  %v759_v54 = vmul.f32 %v2426_v50, %v2254_v36 }
 0x146   : > { %v733_v60 = vadd.f32 %v717_v53, %v524_v52  ;;  %1723 = vmatprep.subr.bf16.mxu1 %v2237_v31  ;;  %v760_v52 = vmul.f32 %v2426_v50, %v2258_v38  ;;  %v2438_v53 = vld [vmem:[%s2615_s3 + $0x2] ss:$0 sm:$0xff]  ;;  %v804_v38 = vmul.f32 %v2431_v25, %v2256_v37 }
 0x147   : > { %v732_v1 = vadd.f32 %v716_v58, %v523_v57  ;;  %v1507_v3 = vpop.f32.mrb[12].mxu0  ;;  %1555 = vmatprep.mubr.f32.mxu1 %v746_v56  ;;  %v528_v17 = vadd.f32 %v2292_v49, %v507_v28  ;;  %v1060_v49 = vld [vmem:[%s2618_s6 + $0x68] sm:$0xff]  ;;  %v801_v56 = vmul.f32 %v2431_v25, %v2254_v36  ;;  %v2449_v57 = vld [vmem:[%s2615_s3 + $0x3] ss:$0 sm:$0xff] }
 0x148   : > { %v719_v7 = vmul.f32 %v1507_v3, %v484_v62  ;;  %v687_v8 = vpop.f32.mrb[13].mxu0  ;;  %1556 = vmatmul.mubr.f32.gmra.mrb[8].mxu1 %v747_v20  ;;  %v749_v12 = vmax.f32 %v733_v60, 0.0  ;;  %v1711_v43 = vpack.c.bf16 %v1060_v49, %v1059_v45  ;;  %v781_v58 = vadd.f32 %v2438_v53, %v760_v52 }
 0x149   : > { %v748_v10 = vmax.f32 %v732_v1, 0.0  ;;  %v718_v41 = vmul.f32 %v687_v8, %v483_v4  ;;  %1731 = vmatpush3.bf16.msra.mxu1 %v2237_v31  ;;  %v780_v60 = vadd.f32 %v2438_v53, %v759_v54  ;;  %v761_v62 = vmul.f32 %v2426_v50, %v2252_v35 }
 0x14a   : > { %v735_v13 = vadd.f32 %v719_v7, %v526_v5  ;;  %1724 = vmatprep.subr.bf16.mxu1 %v2247_v34  ;;  %1712 = vmatprep.subr.bf16.mxu0 %v1711_v43  ;;  %v823_v36 = vadd.f32 %v2449_v57, %v802_v55  ;;  %v803_v3 = vmul.f32 %v2431_v25, %v2252_v35 }
 0x14b   : > { %v734_v22 = vadd.f32 %v718_v41, %v525_v11  ;;  %v1510_v15 = vpop.f32.mrb[14].mxu0  ;;  %1558 = vmatprep.mubr.f32.mxu1 %v748_v10  ;;  %1714 = vmatpush3.bf16.msra.mxu0 %v1711_v43  ;;  %v822_v4 = vadd.f32 %v2449_v57, %v801_v56  ;;  %v783_v7 = vadd.f32 %v2438_v53, %v762_v59 }
 0x14c   : > { %v721_v42 = vmul.f32 %v1510_v15, %v486_v14  ;;  %v697_v18 = vpop.f32.mrb[15].mxu0  ;;  %1559 = vmatmul.mubr.f32.gmra.mrb[10].mxu1 %v749_v12  ;;  %v751_v24 = vmax.f32 %v735_v13, 0.0  ;;  %v764_v8 = vmul.f32 %v2426_v50, %v2260_v39  ;;  %v782_v37 = vadd.f32 %v2438_v53, %v761_v62 }
 0x14d   : > { %v750_v19 = vmax.f32 %v734_v22, 0.0  ;;  %v720_v31 = vmul.f32 %v697_v18, %v485_v16  ;;  %1732 = vmatpush3.bf16.msra.mxu1 %v2247_v34  ;;  %v1061_v34 = vld [vmem:[%s2618_s6 + $0x70] sm:$0xff]  ;;  %v763_v11 = vmul.f32 %v2426_v50, %v2262_v40  ;;  %v806_v41 = vmul.f32 %v2431_v25, %v2260_v39 }
 0x14e   : > { %v737_v26 = vadd.f32 %v721_v42, %v528_v17  ;;  %1725 = vmatprep.subr.bf16.mxu1 %v1711_v43  ;;  %v1715_v47 = vpack.c.bf16 %v1062_v46, %v1061_v34  ;;  %v825_v35 = vadd.f32 %v2449_v57, %v804_v38  ;;  %v805_v14 = vmul.f32 %v2431_v25, %v2262_v40 }
 0x14f   : > { %v736_v27 = vadd.f32 %v720_v31, %v527_v23  ;;  %1561 = vmatprep.mubr.f32.mxu1 %v750_v19  ;;  %v824_v15 = vadd.f32 %v2449_v57, %v803_v3  ;;  %v785_v18 = vadd.f32 %v2438_v53, %v764_v8  ;;  %v766_v19 = vmul.f32 %v2426_v50, %v2276_v44 }
 0x150   : > { %1562 = vmatmul.mubr.f32.gmra.mrb[12].mxu1 %v751_v24  ;;  %v753_v32 = vmax.f32 %v737_v26, 0.0  ;;  %1716 = vmatprep.subr.bf16.mxu0 %v1715_v47  ;;  %v784_v31 = vadd.f32 %v2438_v53, %v763_v11  ;;  %v765_v24 = vmul.f32 %v2426_v50, %v2287_v48  ;;  %v808_v40 = vmul.f32 %v2431_v25, %v2276_v44 }
 0x151   : > { %v752_v29 = vmax.f32 %v736_v27, 0.0  ;;  %1733 = vmatpush3.bf16.msra.mxu1 %v1711_v43  ;;  %1718 = vmatpush3.bf16.msra.mxu0 %v1715_v47  ;;  %v827_v26 = vadd.f32 %v2449_v57, %v806_v41  ;;  %v826_v49 = vadd.f32 %v2449_v57, %v805_v14  ;;  %v768_v52 = vmul.f32 %v2426_v50, %v2307_v61 }
 0x152   : > { %1726 = vmatprep.subr.bf16.mxu1 %v1715_v47  ;;  %v786_v55 = vadd.f32 %v2438_v53, %v765_v24  ;;  %v767_v56 = vmul.f32 %v2426_v50, %v2310_v0 }
 0x153   : > { %1564 = vmatprep.mubr.f32.mxu1 %v752_v29  ;;  %v789_v3 = vadd.f32 %v2438_v53, %v768_v52 }
 0x154   : > { %1565 = vmatmul.mubr.f32.gmra.mrb[14].mxu1 %v753_v32  ;;  %v807_v32 = vmul.f32 %v2431_v25, %v2287_v48  ;;  %v810_v48 = vmul.f32 %v2431_v25, %v2307_v61 }
 0x155   : > { %1734 = vmatpush3.bf16.msra.mxu1 %v1715_v47  ;;  %v787_v47 = vadd.f32 %v2438_v53, %v766_v19 }
 0x156   : > { %v828_v38 = vadd.f32 %v2449_v57, %v807_v32  ;;  %v831_v8 = vadd.f32 %v2449_v57, %v810_v48 }
 0x20b   : > { %v1545_v20 = vpop.f32.mrb[0].mxu1 }
 0x20c   : > { %v1000_v63 = vmul.f32 %v1545_v20, %v781_v58  ;;  %v920_v1 = vpop.f32.mrb[1].mxu1  ;;  %v829_v58 = vadd.f32 %v2449_v57, %v808_v40  ;;  %v774_v40 = vmul.f32 %v2426_v50, %v2377_v33 }
 0x20d   : > { %v999_v28 = vmul.f32 %v920_v1, %v780_v60  ;;  %v809_v60 = vmul.f32 %v2431_v25, %v2310_v0  ;;  %v812_v0 = vmul.f32 %v2431_v25, %v2327_v21 }
 0x20e   : > { %v1016_v5 = vadd.f32 %v1000_v63, %v823_v36 }
 0x20f   : > { %v1015_v9 = vadd.f32 %v999_v28, %v822_v4  ;;  %v1548_v10 = vpop.f32.mrb[2].mxu1  ;;  %v770_v4 = vmul.f32 %v2426_v50, %v2327_v21  ;;  %v830_v41 = vadd.f32 %v2449_v57, %v809_v60 }
 0x210   : > { %v1002_v12 = vmul.f32 %v1548_v10, %v783_v7  ;;  %v930_v13 = vpop.f32.mrb[3].mxu1  ;;  %v1032_v17 = vmax.f32 %v1016_v5, 0.0  ;;  %v788_v5 = vadd.f32 %v2438_v53, %v767_v56  ;;  %v769_v7 = vmul.f32 %v2426_v50, %v2334_v30 }
 0x211   : > { %v1031_v22 = vmax.f32 %v1015_v9, 0.0  ;;  %v1001_v16 = vmul.f32 %v930_v13, %v782_v37  ;;  %v811_v37 = vmul.f32 %v2431_v25, %v2334_v30  ;;  %v791_v14 = vadd.f32 %v2438_v53, %v770_v4 }
 0x212   : > { %v1018_v42 = vadd.f32 %v1002_v12, %v825_v35  ;;  %v814_v30 = vmul.f32 %v2431_v25, %v2353_v2  ;;  %v795_v56 = vadd.f32 %v2438_v53, %v774_v40 }
 0x213   : > { %v1017_v23 = vadd.f32 %v1001_v16, %v824_v15  ;;  %v1551_v39 = vpop.f32.mrb[4].mxu1  ;;  %1599 = vmatprep.mubr.f32.mxu0 %v1031_v22  ;;  %v772_v22 = vmul.f32 %v2426_v50, %v2353_v2  ;;  %v790_v16 = vadd.f32 %v2438_v53, %v769_v7  ;;  %v773_v2 = vmul.f32 %v2426_v50, %v2384_v51 }
 0x214   : > { %v1004_v27 = vmul.f32 %v1551_v39, %v785_v18  ;;  %v940_v29 = vpop.f32.mrb[5].mxu1  ;;  %1600 = vmatmul.mubr.f32.vlgmr.msra.gmra.mrb[16].mxu0 %v1032_v17  ;;  %v1034_v34 = vmax.f32 %v1018_v42, 0.0  ;;  %v771_v17 = vmul.f32 %v2426_v50, %v2357_v6  ;;  %v833_v42 = vadd.f32 %v2449_v57, %v812_v0 }
 0x215   : > { %v1033_v45 = vmax.f32 %v1017_v23, 0.0  ;;  %v1003_v43 = vmul.f32 %v940_v29, %v784_v31  ;;  %v813_v23 = vmul.f32 %v2431_v25, %v2357_v6  ;;  %v832_v31 = vadd.f32 %v2449_v57, %v811_v37 }
 0x216   : > { %v1020_v46 = vadd.f32 %v1004_v27, %v827_v26  ;;  %v793_v29 = vadd.f32 %v2438_v53, %v772_v22  ;;  %v816_v6 = vmul.f32 %v2431_v25, %v2377_v33  ;;  %v794_v33 = vadd.f32 %v2438_v53, %v773_v2 }
 0x217   : > { %v1019_v44 = vadd.f32 %v1003_v43, %v826_v49  ;;  %v1554_v54 = vpop.f32.mrb[6].mxu1  ;;  %1602 = vmatprep.mubr.f32.mxu0 %v1033_v45  ;;  %v792_v49 = vadd.f32 %v2438_v53, %v771_v17  ;;  %v835_v43 = vadd.f32 %v2449_v57, %v814_v30  ;;  %v1350_v53 = vld [vmem:[%s2619_s7] ss:$0 sm:$0xff] }
 0x218   : > { %v1006_v59 = vmul.f32 %v1554_v54, %v787_v47  ;;  %v950_v20 = vpop.f32.mrb[7].mxu1  ;;  %1603 = vmatmul.mubr.f32.gmra.mrb[18].mxu0 %v1034_v34  ;;  %v1036_v63 = vmax.f32 %v1020_v46, 0.0  ;;  %v815_v47 = vmul.f32 %v2431_v25, %v2384_v51 }
 0x219   : > { %v1035_v62 = vmax.f32 %v1019_v44, 0.0  ;;  %v1005_v36 = vmul.f32 %v950_v20, %v786_v55  ;;  %v834_v44 = vadd.f32 %v2449_v57, %v813_v23 }
 0x21a   : > { %v1022_v1 = vadd.f32 %v1006_v59, %v829_v58  ;;  %v837_v59 = vadd.f32 %v2449_v57, %v816_v6  ;;  %v836_v51 = vadd.f32 %v2449_v57, %v815_v47 }
 0x21b   : > { %v1021_v61 = vadd.f32 %v1005_v36, %v828_v38  ;;  %v1557_v28 = vpop.f32.mrb[8].mxu1  ;;  %1605 = vmatprep.mubr.f32.mxu0 %v1035_v62 }
 0x21c   : > { %v1008_v9 = vmul.f32 %v1557_v28, %v789_v3  ;;  %v960_v10 = vpop.f32.mrb[9].mxu1  ;;  %1606 = vmatmul.mubr.f32.gmra.mrb[20].mxu0 %v1036_v63  ;;  %v1038_v12 = vmax.f32 %v1022_v1, 0.0 }
 0x21d   : > { %v1037_v11 = vmax.f32 %v1021_v61, 0.0  ;;  %v1007_v35 = vmul.f32 %v960_v10, %v788_v5 }
 0x21e   : > { %v1024_v13 = vadd.f32 %v1008_v9, %v831_v8 }
 0x21f   : > { %v1023_v21 = vadd.f32 %v1007_v35, %v830_v41  ;;  %v1560_v15 = vpop.f32.mrb[10].mxu1  ;;  %1608 = vmatprep.mubr.f32.mxu0 %v1037_v11 }
 0x220   : > { %v1010_v18 = vmul.f32 %v1560_v15, %v791_v14  ;;  %v970_v19 = vpop.f32.mrb[11].mxu1  ;;  %1609 = vmatmul.mubr.f32.gmra.mrb[22].mxu0 %v1038_v12  ;;  %v1040_v26 = vmax.f32 %v1024_v13, 0.0 }
 0x221   : > { %v1039_v39 = vmax.f32 %v1023_v21, 0.0  ;;  %v1009_v24 = vmul.f32 %v970_v19, %v790_v16 }
 0x222   : > { %v1026_v27 = vadd.f32 %v1010_v18, %v833_v42 }
 0x223   : > { %v1025_v32 = vadd.f32 %v1009_v24, %v832_v31  ;;  %v1563_v45 = vpop.f32.mrb[12].mxu1  ;;  %1611 = vmatprep.mubr.f32.mxu1 %v1039_v39 }
 0x224   : > { %v1012_v34 = vmul.f32 %v1563_v45, %v793_v29  ;;  %v980_v46 = vpop.f32.mrb[13].mxu1  ;;  %1612 = vmatmul.mubr.f32.vlgmr.msra.gmra.mrb[16].mxu1 %v1040_v26  ;;  %v1042_v54 = vmax.f32 %v1026_v27, 0.0 }
 0x225   : > { %v1041_v52 = vmax.f32 %v1025_v32, 0.0  ;;  %v1011_v50 = vmul.f32 %v980_v46, %v792_v49 }
 0x226   : > { %v1028_v55 = vadd.f32 %v1012_v34, %v835_v43 }
 0x227   : > { %v1027_v48 = vadd.f32 %v1011_v50, %v834_v44  ;;  %v1566_v58 = vpop.f32.mrb[14].mxu1  ;;  %1614 = vmatprep.mubr.f32.mxu1 %v1041_v52 }
 0x228   : > { %v1014_v20 = vmul.f32 %v1566_v58, %v795_v56  ;;  %v990_v60 = vpop.f32.mrb[15].mxu1  ;;  %1615 = vmatmul.mubr.f32.gmra.mrb[18].mxu1 %v1042_v54  ;;  %v1044_v38 = vmax.f32 %v1028_v55, 0.0 }
 0x229   : > { %v1043_v62 = vmax.f32 %v1027_v48, 0.0  ;;  %v1013_v25 = vmul.f32 %v990_v60, %v794_v33 }
 0x22a   : > { %v1030_v36 = vadd.f32 %v1014_v20, %v837_v59 }
 0x22b   : > { %v1029_v63 = vadd.f32 %v1013_v25, %v836_v51  ;;  %1617 = vmatprep.mubr.f32.mxu1 %v1043_v62 }
 0x22c   : > { %1618 = vmatmul.mubr.f32.gmra.mrb[20].mxu1 %v1044_v38  ;;  %v1046_v3 = vmax.f32 %v1030_v36, 0.0 }
 0x22d   : > { %v1045_v1 = vmax.f32 %v1029_v63, 0.0 }
 0x22f   : > { %1620 = vmatprep.mubr.f32.mxu1 %v1045_v1 }
 0x230   : > { %1621 = vmatmul.mubr.f32.gmra.mrb[22].mxu1 %v1046_v3 }
 0x2e7   : > { %v1601_v4 = vpop.f32.mrb[16].mxu0 }
 0x2e8   : > { %v1142_v61 = vadd.f32 %v1601_v4, %v1350_v53  ;;  %v1136_v28 = vpop.f32.mrb[17].mxu0 }
 0x2e9   : > { %v1137_v5 = vadd.f32 %v1350_v53, %v1136_v28 }
 0x2ea   : > { %1216 = vst [vmem:[%s2544_s22 + $0x8] sm:$0xff] %v1142_v61 }
 0x2eb   : > { %1215 = vst [vmem:[%s2544_s22] sm:$0xff] %v1137_v5  ;;  %v1604_v57 = vpop.f32.mrb[18].mxu0 }
 0x2ec   : > { %v1152_v7 = vadd.f32 %v1604_v57, %v1350_v53  ;;  %v1146_v0 = vpop.f32.mrb[19].mxu0 }
 0x2ed   : > { %v1147_v8 = vadd.f32 %v1350_v53, %v1146_v0 }
 0x2ee   : > { %1218 = vst [vmem:[%s2544_s22 + $0x18] sm:$0xff] %v1152_v7 }
 0x2ef   : > { %1217 = vst [vmem:[%s2544_s22 + $0x10] sm:$0xff] %v1147_v8  ;;  %v1607_v9 = vpop.f32.mrb[20].mxu0 }
 0x2f0   : > { %v1162_v10 = vadd.f32 %v1607_v9, %v1350_v53  ;;  %v1156_v37 = vpop.f32.mrb[21].mxu0 }
 0x2f1   : > { %v1157_v11 = vadd.f32 %v1350_v53, %v1156_v37 }
 0x2f2   : > { %1220 = vst [vmem:[%s2544_s22 + $0x28] sm:$0xff] %v1162_v10 }
 0x2f3   : > { %1219 = vst [vmem:[%s2544_s22 + $0x20] sm:$0xff] %v1157_v11  ;;  %v1610_v41 = vpop.f32.mrb[22].mxu0 }
 0x2f4   : > { %v1172_v35 = vadd.f32 %v1610_v41, %v1350_v53  ;;  %v1166_v12 = vpop.f32.mrb[23].mxu0 }
 0x2f5   : > { %v1167_v13 = vadd.f32 %v1350_v53, %v1166_v12 }
 0x2f6   : > { %1222 = vst [vmem:[%s2544_s22 + $0x38] sm:$0xff] %v1172_v35 }
 0x2f7   : > { %1221 = vst [vmem:[%s2544_s22 + $0x30] sm:$0xff] %v1167_v13  ;;  %v1613_v14 = vpop.f32.mrb[16].mxu1 }
 0x2f8   : > { %v1182_v22 = vadd.f32 %v1613_v14, %v1350_v53  ;;  %v1176_v21 = vpop.f32.mrb[17].mxu1 }
 0x2f9   : > { %v1177_v15 = vadd.f32 %v1350_v53, %v1176_v21 }
 0x2fa   : > { %1224 = vst [vmem:[%s2544_s22 + $0x48] sm:$0xff] %v1182_v22 }
 0x2fb   : > { %1223 = vst [vmem:[%s2544_s22 + $0x40] sm:$0xff] %v1177_v15  ;;  %v1616_v16 = vpop.f32.mrb[18].mxu1 }
 0x2fc   : > { %v1192_v17 = vadd.f32 %v1616_v16, %v1350_v53  ;;  %v1186_v30 = vpop.f32.mrb[19].mxu1 }
 0x2fd   : > { %v1187_v42 = vadd.f32 %v1350_v53, %v1186_v30 }
 0x2fe   : > { %1226 = vst [vmem:[%s2544_s22 + $0x58] sm:$0xff] %v1192_v17 }
 0x2ff   : > { %1225 = vst [vmem:[%s2544_s22 + $0x50] sm:$0xff] %v1187_v42  ;;  %v1619_v18 = vpop.f32.mrb[20].mxu1 }
 0x300   : > { %v1202_v19 = vadd.f32 %v1619_v18, %v1350_v53  ;;  %v1196_v23 = vpop.f32.mrb[21].mxu1 }
 0x301   : > { %v1197_v39 = vadd.f32 %v1350_v53, %v1196_v23 }
 0x302   : > { %1228 = vst [vmem:[%s2544_s22 + $0x68] sm:$0xff] %v1202_v19 }
 0x303   : > { %1227 = vst [vmem:[%s2544_s22 + $0x60] sm:$0xff] %v1197_v39  ;;  %v1622_v31 = vpop.f32.mrb[22].mxu1 }
 0x304   : > { %v1212_v24 = vadd.f32 %v1622_v31, %v1350_v53  ;;  %v1206_v40 = vpop.f32.mrb[23].mxu1 }
 0x305   : > { %v1207_v26 = vadd.f32 %v1350_v53, %v1206_v40 }
 0x306   : > { %1230 = vst [vmem:[%s2544_s22 + $0x78] sm:$0xff] %v1212_v24 }
 0x307   : > { %1229 = vst [vmem:[%s2544_s22 + $0x70] sm:$0xff] %v1207_v26 }
 0x308   : > { %1832 = shalt.err (!%p1829_p4)
}
 0x309   : > { %s1833_s16 = scalar_lea.hbm %s2565_s20, 2048  ;;  %s1837_s25 = scalar_lea.hbm %s2620_s8, 8192 }
 0x30a   : > { %p1834_p5 = scmp.ne.s32.totalorder %s2565_s20, %s1833_s16  ;;  %p1838_p1 = scmp.lt.u32.totalorder %s2565_s20, %s2620_s8 }
 0x30b   : > { %p1839_p3 = scmp.lt.u32.totalorder %s1837_s25, %s1833_s16  ;;  %p1841_p6 = scmp.lt.u32.totalorder %s1833_s16, %s2565_s20 }
 0x30c   : > { %p1835_p7 = pnand %p1834_p5, %p2630_p11 }
 0x30d   : > { %p1840_p10 = por %p1839_p3, %p1838_p1 }
 0x30e   : > { %p1836_p13 = pneg %p1835_p7 }
 0x30f   : > { %p1842_p12 = por %p1841_p6, %p1840_p10 }
 0x311   : > { %p1843_p8 = pnand %p1842_p12, %p1836_p13 }
 0x313   : > { %1846 = shalt.err (!%p1843_p8)
}
 0x314   : > { %s1893_s12 = smov 128   ;;  %s1894_s13 = smov 8  }
 0x315   : > { %1737 = dma.vmem_to_hbm [thread:$0]  (%p2630_p11), %s2567_s24, 2048, %s2565_s20, %s1232_s9, %s1893_s12, %s1893_s12, %s1894_s13  }
 0x316 PF: > { %p1748_p9 = scmp.ge.s32.totalorder %s1885_s30, 2  ;;  %s1260_s21 = sand.u32 1, %s1873_s27  }
 0x317   : > { %p2631_p0 = scmp.ne.s32.totalorder %s2626_s18, 0  ;;  %s1261_s15 = scalar_lea.sflag [#allocation4], %s1260_s21 }
 0x319   : > { %p1744_p2 = pnand %p1748_p9, %p2631_p0 }
 0x31b   : > { %1868 = dma.done.wait (!%p1744_p2), %s1261_s15, 2048  }
 0x31c   : > { %1870 = vsyncadd (!%p1744_p2), %s1261_s15, 4294965248  ;;  %p21_p4 = scmp.ge.s32.totalorder %s1965_s11, 6   ;;  %s2632_s27 = smov %s1877_s28 }
 0x31d   : > { %s2633_s28 = smov %s1881_s29  ;;  %s2634_s29 = smov %s1977_s14 }
 0x31e   : > { %s2635_s30 = smov %s1965_s11  ;;  %23 = sbr.rel (!%p21_p4) target bundleno = 5 (0x5), region = 100 }
 0x325   :  { %1266 = vsyncpa [#allocation3], 1 }
 0x326   :  { %1268 = vsyncpa [#allocation3 + $0x1], 1 }
 0x327   :  { %1269 = vsyncpa [#allocation4], 1 }
 0x328   :  { %1271 = vsyncpa [#allocation4 + $0x1], 1 }

</bundles_post_ra>
